<compile_context>
chip_gen: v7x
topology: tpu7x:2x2x1
jax: 0.10.0
libtpu: 0.0.40
codegen_flags: <defaults>
</compile_context>

<pallas_src>
import functools

import jax
import jax.numpy as jnp
from jax.experimental import pallas as pl
from jax.experimental.pallas import tpu as pltpu

NUM_WORDS = 100
HIDDEN = 32
NUM_LAYERS = 2
KQV = 32          # must equal HIDDEN for the PyTorch module's forward to run
BATCH = 2
SEQ = 8


def attn_gru_kernel(ids_ref, emb_ref, wqkv_ref, bqkv_ref,
                    wih_ref, whh_ref, bih_ref, bhh_ref,
                    wo_ref, bo_ref, out_ref, gi_ref, xseq_ref,
                    *, batch, seq, num_layers):
    B, S, L = batch, seq, num_layers
    SB = S * B
    V, H = emb_ref.shape
    K = wqkv_ref.shape[1] // 3

    # ---- 1. Embedding lookup: one-hot matmul, a single (SB,V)@(V,H) op ----
    ids = ids_ref[...]                                           # (SB, 1) int32, time-major (row = t*B + b)
    vocab_iota = jax.lax.broadcasted_iota(jnp.int32, (SB, V), 1)
    onehot = (ids == vocab_iota).astype(jnp.float32)             # (SB, V)
    x = jnp.dot(onehot, emb_ref[...],
                preferred_element_type=jnp.float32)              # (SB, H)

    # ---- 2. Attention: fused QKV + block-diagonal packed score matmul ----
    qkv = jnp.dot(x, wqkv_ref[...],
                  preferred_element_type=jnp.float32) + bqkv_ref[...]   # (SB, 3K)
    k = qkv[:, 0:K]
    q = qkv[:, K:2 * K]
    v = qkv[:, 2 * K:3 * K]
    scores = jnp.einsum('ik,jk->ij', q, k,
                        preferred_element_type=jnp.float32) * (1.0 / (K ** 0.5))  # (SB, SB)
    # Mask out cross-sequence positions: rows/cols belong to the same batch
    # element iff their indices are congruent mod B (time-major flattening).
    rows = jax.lax.broadcasted_iota(jnp.int32, (SB, SB), 0)
    cols = jax.lax.broadcasted_iota(jnp.int32, (SB, SB), 1)
    if B & (B - 1) == 0:
        same_seq = ((rows ^ cols) & (B - 1)) == 0
    else:
        same_seq = jax.lax.rem(rows - cols, B) == 0
    scores = jnp.where(same_seq, scores, -1e30)
    scores = scores - jnp.max(scores, axis=-1, keepdims=True)
    e = jnp.exp(scores)
    p = e / jnp.sum(e, axis=-1, keepdims=True)        # exact reciprocal (PyTorch parity)
    x_flat = jnp.dot(p, v, preferred_element_type=jnp.float32)   # (SB, K==H), time-major

    # ---- 3. Multi-layer GRU, gate order [r, z, n], zero initial hidden ----
    h = jnp.zeros((B, H), dtype=jnp.float32)
    for l in range(L):
        w_hh = whh_ref[l]                                        # (H, 3H), gates [r|z|n]
        b_hh = bhh_ref[l]                                        # (1, 3H)
        # Hoisted input-side projection: one (SB,H)@(H,3H) matmul per layer,
        # result parked in VMEM scratch so the time loop only slices a ref.
        gi_ref[...] = jnp.dot(x_flat, wih_ref[l],
                              preferred_element_type=jnp.float32) + bih_ref[l]

        h = jnp.zeros((B, H), dtype=jnp.float32)
        for t in range(S):
            gi_t = gi_ref[pl.ds(t * B, B), :]                    # (B, 3H)
            # One fused hidden-side matmul per step (critical path).
            gh = jnp.dot(h, w_hh, preferred_element_type=jnp.float32) + b_hh   # (B, 3H)
            # r and z share one sigmoid over the lane-contiguous (B, 2H) block.
            rz = jax.nn.sigmoid(gi_t[:, 0:2 * H] + gh[:, 0:2 * H])
            r = rz[:, 0:H]
            z = rz[:, H:2 * H]
            n = jnp.tanh(gi_t[:, 2 * H:3 * H] + r * gh[:, 2 * H:3 * H])
            h = (1.0 - z) * n + z * h
            if l + 1 < L:
                xseq_ref[pl.ds(t * B, B), :] = h                 # layer output -> scratch
        if l + 1 < L:
            x_flat = xseq_ref[...]                               # next layer's (SB, H) input

    # ---- 4. Final linear on the last timestep's hidden state ----
    out_ref[...] = jnp.dot(h, wo_ref[...],
                           preferred_element_type=jnp.float32) + bo_ref[...]


def init_params(key):
    ks = jax.random.split(key, 16)

    def uni(k, shape, fan_in):
        bound = 1.0 / (fan_in ** 0.5)
        return jax.random.uniform(k, shape, jnp.float32, -bound, bound)

    params = {
        'embedding': jax.random.normal(ks[0], (NUM_WORDS, HIDDEN), jnp.float32),
        # Attn linears stored PyTorch-style (out, in) + biases as (1, out)
        'wk': uni(ks[1], (KQV, HIDDEN), HIDDEN),
        'bk': uni(ks[2], (1, KQV), HIDDEN),
        'wq': uni(ks[3], (KQV, HIDDEN), HIDDEN),
        'bq': uni(ks[4], (1, KQV), HIDDEN),
        'wv': uni(ks[5], (KQV, HIDDEN), HIDDEN),
        'bv': uni(ks[6], (1, KQV), HIDDEN),
        # GRU weights, PyTorch layout (3H, H) per layer, gate order [r, z, n]
        'wih': uni(ks[7], (NUM_LAYERS, 3 * HIDDEN, HIDDEN), HIDDEN),
        'whh': uni(ks[8], (NUM_LAYERS, 3 * HIDDEN, HIDDEN), HIDDEN),
        'bih': uni(ks[9], (NUM_LAYERS, 3 * HIDDEN), HIDDEN),
        'bhh': uni(ks[10], (NUM_LAYERS, 3 * HIDDEN), HIDDEN),
        # Final classifier
        'wo': uni(ks[11], (2, HIDDEN), HIDDEN),
        'bo': uni(ks[12], (1, 2), HIDDEN),
    }
    return params


def _prep_kernel_params(params):
    """PyTorch-layout params -> kernel layout (pre-transposed, gate-concat)."""
    L, H = NUM_LAYERS, HIDDEN
    wqkv_t = jnp.concatenate(
        [params['wk'].T, params['wq'].T, params['wv'].T], axis=1)    # (H, 3K), cols [k|q|v]
    bqkv = jnp.concatenate(
        [params['bk'], params['bq'], params['bv']], axis=1)          # (1, 3K)
    wih_t = params['wih'].transpose(0, 2, 1)                         # (L, H, 3H), cols [r|z|n]
    whh_t = params['whh'].transpose(0, 2, 1)                         # (L, H, 3H)
    bih = params['bih'].reshape(L, 1, 3 * H)
    bhh = params['bhh'].reshape(L, 1, 3 * H)
    wo_t = params['wo'].T                                            # (H, 2)
    return (params['embedding'], wqkv_t, bqkv, wih_t, whh_t, bih, bhh,
            wo_t, params['bo'])


@jax.jit
def attn_gru_forward(params, input_ids):
    B, S = input_ids.shape
    # Time-major flattening (row = t*B + b): per-timestep state is a
    # contiguous row block, so the GRU loop only needs pl.ds row slices.
    ids_tm = input_ids.T.reshape(S * B, 1).astype(jnp.int32)
    args = (ids_tm,) + _prep_kernel_params(params)
    vmem = pl.BlockSpec(memory_space=pltpu.MemorySpace.VMEM)
    return pl.pallas_call(
        functools.partial(attn_gru_kernel, batch=B, seq=S,
                          num_layers=NUM_LAYERS),
        out_shape=jax.ShapeDtypeStruct((B, 2), jnp.float32),
        in_specs=[vmem] * len(args),
        out_specs=vmem,
        scratch_shapes=[
            pltpu.VMEM((S * B, 3 * HIDDEN), jnp.float32),   # gi_ref
            pltpu.VMEM((S * B, HIDDEN), jnp.float32),       # xseq_ref
        ],
    )(*args)


def reference_forward(params, input_ids):
    # Pure-JAX reference reproducing the PyTorch forward, for verification.
    x = params['embedding'][input_ids].astype(jnp.float32)
    k = x @ params['wk'].T + params['bk'][0]
    q = x @ params['wq'].T + params['bq'][0]
    v = x @ params['wv'].T + params['bv'][0]
    s = jnp.einsum('bik,bjk->bij', q, k) / (KQV ** 0.5)
    w = jax.nn.softmax(s, axis=-1)
    layer_in = jnp.einsum('bij,bjk->bik', w, v)
    B, S = input_ids.shape
    h = jnp.zeros((B, HIDDEN), jnp.float32)
    for l in range(NUM_LAYERS):
        w_ih, w_hh = params['wih'][l], params['whh'][l]
        b_ih, b_hh = params['bih'][l], params['bhh'][l]
        h = jnp.zeros((B, HIDDEN), jnp.float32)
        outs = []
        for t in range(S):
            xt = layer_in[:, t, :]
            gi = xt @ w_ih.T + b_ih
            gh = h @ w_hh.T + b_hh
            r = jax.nn.sigmoid(gi[:, :HIDDEN] + gh[:, :HIDDEN])
            z = jax.nn.sigmoid(gi[:, HIDDEN:2 * HIDDEN] + gh[:, HIDDEN:2 * HIDDEN])
            n = jnp.tanh(gi[:, 2 * HIDDEN:] + r * gh[:, 2 * HIDDEN:])
            h = (1.0 - z) * n + z * h
            outs.append(h)
        layer_in = jnp.stack(outs, axis=1)
    return h @ params['wo'].T + params['bo'][0]


if __name__ == "__main__":
    key = jax.random.PRNGKey(0)
    pkey, ikey = jax.random.split(key)
    params = init_params(pkey)
    input_ids = jax.random.randint(ikey, (BATCH, SEQ), 0, NUM_WORDS, jnp.int32)

    out = attn_gru_forward(params, input_ids)
    out = jax.block_until_ready(out)

    ref = reference_forward(params, input_ids)
    assert out.shape == (BATCH, 2)
    # Remaining deviation is only MXU accumulation/rounding order vs XLA.
    assert jnp.allclose(out, ref, atol=5e-3, rtol=5e-3), (out, ref)
    print("KERNEL_OK")
</pallas_src>

<mosaic_0001>
module attributes {stable_mosaic.version = 11 : i64} {
  func.func @attn_gru_kernel(%arg0: memref<16x1xi32, #tpu.memory_space<vmem>>, %arg1: memref<100x32xf32, #tpu.memory_space<vmem>>, %arg2: memref<32x96xf32, #tpu.memory_space<vmem>>, %arg3: memref<1x96xf32, #tpu.memory_space<vmem>>, %arg4: memref<2x32x96xf32, #tpu.memory_space<vmem>>, %arg5: memref<2x32x96xf32, #tpu.memory_space<vmem>>, %arg6: memref<2x1x96xf32, #tpu.memory_space<vmem>>, %arg7: memref<2x1x96xf32, #tpu.memory_space<vmem>>, %arg8: memref<32x2xf32, #tpu.memory_space<vmem>>, %arg9: memref<1x2xf32, #tpu.memory_space<vmem>>, %arg10: memref<2x2xf32, #tpu.memory_space<vmem>>, %arg11: memref<16x96xf32, #tpu.memory_space<vmem>>, %arg12: memref<16x32xf32, #tpu.memory_space<vmem>>) attributes {dimension_semantics = [], scalar_prefetch = 0 : i64, scratch_operands = 2 : i64, tpu.core_type = #tpu.core_type<tc>} {
    %c0 = arith.constant 0 : index
    %c0_0 = arith.constant 0 : index
    %0 = vector.load %arg0[%c0, %c0_0] : memref<16x1xi32, #tpu.memory_space<vmem>>, vector<16x1xi32>
    %1 = tpu.iota {dimensions = array<i32: 1>} : vector<16x100xi32>
    %2 = vector.broadcast %0 : vector<16x1xi32> to vector<16x100xi32>
    %3 = arith.cmpi eq, %2, %1 : vector<16x100xi32>
    %4 = arith.extui %3 : vector<16x100xi1> to vector<16x100xi32>
    %5 = arith.sitofp %4 : vector<16x100xi32> to vector<16x100xf32>
    %c0_1 = arith.constant 0 : index
    %c0_2 = arith.constant 0 : index
    %6 = vector.load %arg1[%c0_1, %c0_2] : memref<100x32xf32, #tpu.memory_space<vmem>>, vector<100x32xf32>
    %cst = arith.constant dense<0.000000e+00> : vector<16x32xf32>
    %7 = tpu.matmul %5, %6, %cst {dimension_numbers = #tpu.dot_dimension_numbers<[1], [0], [0], [1], [0, 0, 1, 1], [], []>} : vector<16x100xf32>, vector<100x32xf32>, vector<16x32xf32> -> vector<16x32xf32>
    %c0_3 = arith.constant 0 : index
    %c0_4 = arith.constant 0 : index
    %8 = vector.load %arg2[%c0_3, %c0_4] : memref<32x96xf32, #tpu.memory_space<vmem>>, vector<32x96xf32>
    %cst_5 = arith.constant dense<0.000000e+00> : vector<16x96xf32>
    %9 = tpu.matmul %7, %8, %cst_5 {dimension_numbers = #tpu.dot_dimension_numbers<[1], [0], [0], [1], [0, 0, 1, 1], [], []>} : vector<16x32xf32>, vector<32x96xf32>, vector<16x96xf32> -> vector<16x96xf32>
    %c0_6 = arith.constant 0 : index
    %c0_7 = arith.constant 0 : index
    %10 = vector.load %arg3[%c0_6, %c0_7] : memref<1x96xf32, #tpu.memory_space<vmem>>, vector<1x96xf32>
    %11 = vector.broadcast %10 : vector<1x96xf32> to vector<16x96xf32>
    %12 = arith.addf %9, %11 : vector<16x96xf32>
    %13 = vector.extract_strided_slice %12 {offsets = [0, 0], sizes = [16, 32], strides = [1, 1]} : vector<16x96xf32> to vector<16x32xf32>
    %14 = vector.extract_strided_slice %12 {offsets = [0, 32], sizes = [16, 32], strides = [1, 1]} : vector<16x96xf32> to vector<16x32xf32>
    %15 = vector.extract_strided_slice %12 {offsets = [0, 64], sizes = [16, 32], strides = [1, 1]} : vector<16x96xf32> to vector<16x32xf32>
    "tpu.trace_start"() <{level = 10 : i32, message = "ik,jk->ij"}> : () -> ()
    %cst_8 = arith.constant dense<0.000000e+00> : vector<16x16xf32>
    %16 = tpu.matmul %14, %13, %cst_8 {dimension_numbers = #tpu.dot_dimension_numbers<[1], [1], [0], [0], [0, 0, 1, 0], [], []>} : vector<16x32xf32>, vector<16x32xf32>, vector<16x16xf32> -> vector<16x16xf32>
    "tpu.trace_stop"() : () -> ()
    %cst_9 = arith.constant 0.176776692 : f32
    %17 = vector.broadcast %cst_9 : f32 to vector<16x16xf32>
    %18 = arith.mulf %16, %17 : vector<16x16xf32>
    %19 = tpu.iota {dimensions = array<i32: 0>} : vector<16x16xi32>
    %20 = tpu.iota {dimensions = array<i32: 1>} : vector<16x16xi32>
    %21 = arith.xori %19, %20 : vector<16x16xi32>
    %c1_i32 = arith.constant 1 : i32
    %22 = vector.broadcast %c1_i32 : i32 to vector<16x16xi32>
    %23 = arith.andi %21, %22 : vector<16x16xi32>
    %c0_i32 = arith.constant 0 : i32
    %24 = vector.broadcast %c0_i32 : i32 to vector<16x16xi32>
    %25 = arith.cmpi eq, %23, %24 : vector<16x16xi32>
    %cst_10 = arith.constant -1.000000e+30 : f32
    %26 = vector.broadcast %cst_10 : f32 to vector<16x16xf32>
    %27 = arith.select %25, %18, %26 : vector<16x16xi1>, vector<16x16xf32>
    %cst_11 = arith.constant dense<0xFF800000> : vector<16xf32>
    %28 = vector.multi_reduction <maximumf>, %27, %cst_11 [1] : vector<16x16xf32> to vector<16xf32>
    %29 = vector.shape_cast %28 : vector<16xf32> to vector<16x1xf32>
    %30 = vector.broadcast %29 : vector<16x1xf32> to vector<16x16xf32>
    %31 = arith.subf %27, %30 : vector<16x16xf32>
    %32 = math.exp %31 : vector<16x16xf32>
    %cst_12 = arith.constant dense<0.000000e+00> : vector<16xf32>
    %33 = vector.multi_reduction <add>, %32, %cst_12 [1] : vector<16x16xf32> to vector<16xf32>
    %34 = vector.shape_cast %33 : vector<16xf32> to vector<16x1xf32>
    %35 = vector.broadcast %34 : vector<16x1xf32> to vector<16x16xf32>
    %36 = arith.divf %32, %35 : vector<16x16xf32>
    %cst_13 = arith.constant dense<0.000000e+00> : vector<16x32xf32>
    %37 = tpu.matmul %36, %15, %cst_13 {dimension_numbers = #tpu.dot_dimension_numbers<[1], [0], [0], [1], [0, 0, 1, 1], [], []>} : vector<16x16xf32>, vector<16x32xf32>, vector<16x32xf32> -> vector<16x32xf32>
    %c0_14 = arith.constant 0 : index
    %c0_15 = arith.constant 0 : index
    %c0_16 = arith.constant 0 : index
    %38 = vector.load %arg5[%c0_14, %c0_15, %c0_16] : memref<2x32x96xf32, #tpu.memory_space<vmem>>, vector<1x32x96xf32>
    %39 = vector.shape_cast %38 : vector<1x32x96xf32> to vector<32x96xf32>
    %c0_17 = arith.constant 0 : index
    %c0_18 = arith.constant 0 : index
    %c0_19 = arith.constant 0 : index
    %40 = vector.load %arg7[%c0_17, %c0_18, %c0_19] : memref<2x1x96xf32, #tpu.memory_space<vmem>>, vector<1x1x96xf32>
    %41 = vector.shape_cast %40 : vector<1x1x96xf32> to vector<1x96xf32>
    %c0_20 = arith.constant 0 : index
    %c0_21 = arith.constant 0 : index
    %c0_22 = arith.constant 0 : index
    %42 = vector.load %arg4[%c0_20, %c0_21, %c0_22] : memref<2x32x96xf32, #tpu.memory_space<vmem>>, vector<1x32x96xf32>
    %43 = vector.shape_cast %42 : vector<1x32x96xf32> to vector<32x96xf32>
    %cst_23 = arith.constant dense<0.000000e+00> : vector<16x96xf32>
    %44 = tpu.matmul %37, %43, %cst_23 {dimension_numbers = #tpu.dot_dimension_numbers<[1], [0], [0], [1], [0, 0, 1, 1], [], []>} : vector<16x32xf32>, vector<32x96xf32>, vector<16x96xf32> -> vector<16x96xf32>
    %c0_24 = arith.constant 0 : index
    %c0_25 = arith.constant 0 : index
    %c0_26 = arith.constant 0 : index
    %45 = vector.load %arg6[%c0_24, %c0_25, %c0_26] : memref<2x1x96xf32, #tpu.memory_space<vmem>>, vector<1x1x96xf32>
    %46 = vector.shape_cast %45 : vector<1x1x96xf32> to vector<1x96xf32>
    %47 = vector.broadcast %46 : vector<1x96xf32> to vector<16x96xf32>
    %48 = arith.addf %44, %47 : vector<16x96xf32>
    %c0_27 = arith.constant 0 : index
    %c0_28 = arith.constant 0 : index
    %49 = vector.load %arg11[%c0_27, %c0_28] : memref<16x96xf32, #tpu.memory_space<vmem>>, vector<16x96xf32>
    tpu.vector_store %arg11[%c0_27, %c0_28], %48 {strides = array<i32>} : memref<16x96xf32, #tpu.memory_space<vmem>>, vector<16x96xf32>,
    %cst_29 = arith.constant 0.000000e+00 : f32
    %50 = vector.broadcast %cst_29 : f32 to vector<2x32xf32>
    %c0_30 = arith.constant 0 : index
    %c0_31 = arith.constant 0 : index
    %51 = vector.load %arg11[%c0_30, %c0_31] : memref<16x96xf32, #tpu.memory_space<vmem>>, vector<2x96xf32>
    %cst_32 = arith.constant dense<0.000000e+00> : vector<2x96xf32>
    %52 = tpu.matmul %50, %39, %cst_32 {dimension_numbers = #tpu.dot_dimension_numbers<[1], [0], [0], [1], [0, 0, 1, 1], [], []>} : vector<2x32xf32>, vector<32x96xf32>, vector<2x96xf32> -> vector<2x96xf32>
    %53 = vector.broadcast %41 : vector<1x96xf32> to vector<2x96xf32>
    %54 = arith.addf %52, %53 : vector<2x96xf32>
    %55 = vector.extract_strided_slice %51 {offsets = [0, 0], sizes = [2, 64], strides = [1, 1]} : vector<2x96xf32> to vector<2x64xf32>
    %56 = vector.extract_strided_slice %54 {offsets = [0, 0], sizes = [2, 64], strides = [1, 1]} : vector<2x96xf32> to vector<2x64xf32>
    %57 = arith.addf %55, %56 : vector<2x64xf32>
    %58 = arith.negf %57 : vector<2x64xf32>
    %59 = math.exp %58 : vector<2x64xf32>
    %cst_33 = arith.constant 1.000000e+00 : f32
    %60 = vector.broadcast %cst_33 : f32 to vector<2x64xf32>
    %61 = arith.addf %60, %59 : vector<2x64xf32>
    %62 = arith.divf %60, %61 : vector<2x64xf32>
    %63 = vector.extract_strided_slice %62 {offsets = [0, 0], sizes = [2, 32], strides = [1, 1]} : vector<2x64xf32> to vector<2x32xf32>
    %64 = vector.extract_strided_slice %62 {offsets = [0, 32], sizes = [2, 32], strides = [1, 1]} : vector<2x64xf32> to vector<2x32xf32>
    %65 = vector.extract_strided_slice %51 {offsets = [0, 64], sizes = [2, 32], strides = [1, 1]} : vector<2x96xf32> to vector<2x32xf32>
    %66 = vector.extract_strided_slice %54 {offsets = [0, 64], sizes = [2, 32], strides = [1, 1]} : vector<2x96xf32> to vector<2x32xf32>
    %67 = arith.mulf %63, %66 : vector<2x32xf32>
    %68 = arith.addf %65, %67 : vector<2x32xf32>
    %69 = math.tanh %68 : vector<2x32xf32>
    %cst_34 = arith.constant 1.000000e+00 : f32
    %70 = vector.broadcast %cst_34 : f32 to vector<2x32xf32>
    %71 = arith.subf %70, %64 : vector<2x32xf32>
    %72 = arith.mulf %71, %69 : vector<2x32xf32>
    %73 = arith.mulf %64, %50 : vector<2x32xf32>
    %74 = arith.addf %72, %73 : vector<2x32xf32>
    %c0_35 = arith.constant 0 : index
    %c0_36 = arith.constant 0 : index
    %75 = vector.load %arg12[%c0_35, %c0_36] : memref<16x32xf32, #tpu.memory_space<vmem>>, vector<2x32xf32>
    tpu.vector_store %arg12[%c0_35, %c0_36], %74 {strides = array<i32>} : memref<16x32xf32, #tpu.memory_space<vmem>>, vector<2x32xf32>,
    %c2 = arith.constant 2 : index
    %c0_37 = arith.constant 0 : index
    %76 = vector.load %arg11[%c2, %c0_37] : memref<16x96xf32, #tpu.memory_space<vmem>>, vector<2x96xf32>
    %cst_38 = arith.constant dense<0.000000e+00> : vector<2x96xf32>
    %77 = tpu.matmul %74, %39, %cst_38 {dimension_numbers = #tpu.dot_dimension_numbers<[1], [0], [0], [1], [0, 0, 1, 1], [], []>} : vector<2x32xf32>, vector<32x96xf32>, vector<2x96xf32> -> vector<2x96xf32>
    %78 = vector.broadcast %41 : vector<1x96xf32> to vector<2x96xf32>
    %79 = arith.addf %77, %78 : vector<2x96xf32>
    %80 = vector.extract_strided_slice %76 {offsets = [0, 0], sizes = [2, 64], strides = [1, 1]} : vector<2x96xf32> to vector<2x64xf32>
    %81 = vector.extract_strided_slice %79 {offsets = [0, 0], sizes = [2, 64], strides = [1, 1]} : vector<2x96xf32> to vector<2x64xf32>
    %82 = arith.addf %80, %81 : vector<2x64xf32>
    %83 = arith.negf %82 : vector<2x64xf32>
    %84 = math.exp %83 : vector<2x64xf32>
    %cst_39 = arith.constant 1.000000e+00 : f32
    %85 = vector.broadcast %cst_39 : f32 to vector<2x64xf32>
    %86 = arith.addf %85, %84 : vector<2x64xf32>
    %87 = arith.divf %85, %86 : vector<2x64xf32>
    %88 = vector.extract_strided_slice %87 {offsets = [0, 0], sizes = [2, 32], strides = [1, 1]} : vector<2x64xf32> to vector<2x32xf32>
    %89 = vector.extract_strided_slice %87 {offsets = [0, 32], sizes = [2, 32], strides = [1, 1]} : vector<2x64xf32> to vector<2x32xf32>
    %90 = vector.extract_strided_slice %76 {offsets = [0, 64], sizes = [2, 32], strides = [1, 1]} : vector<2x96xf32> to vector<2x32xf32>
    %91 = vector.extract_strided_slice %79 {offsets = [0, 64], sizes = [2, 32], strides = [1, 1]} : vector<2x96xf32> to vector<2x32xf32>
    %92 = arith.mulf %88, %91 : vector<2x32xf32>
    %93 = arith.addf %90, %92 : vector<2x32xf32>
    %94 = math.tanh %93 : vector<2x32xf32>
    %cst_40 = arith.constant 1.000000e+00 : f32
    %95 = vector.broadcast %cst_40 : f32 to vector<2x32xf32>
    %96 = arith.subf %95, %89 : vector<2x32xf32>
    %97 = arith.mulf %96, %94 : vector<2x32xf32>
    %98 = arith.mulf %89, %74 : vector<2x32xf32>
    %99 = arith.addf %97, %98 : vector<2x32xf32>
    %c2_41 = arith.constant 2 : index
    %c0_42 = arith.constant 0 : index
    %100 = vector.load %arg12[%c2_41, %c0_42] : memref<16x32xf32, #tpu.memory_space<vmem>>, vector<2x32xf32>
    tpu.vector_store %arg12[%c2_41, %c0_42], %99 {strides = array<i32>} : memref<16x32xf32, #tpu.memory_space<vmem>>, vector<2x32xf32>,
    %c4 = arith.constant 4 : index
    %c0_43 = arith.constant 0 : index
    %101 = vector.load %arg11[%c4, %c0_43] : memref<16x96xf32, #tpu.memory_space<vmem>>, vector<2x96xf32>
    %cst_44 = arith.constant dense<0.000000e+00> : vector<2x96xf32>
    %102 = tpu.matmul %99, %39, %cst_44 {dimension_numbers = #tpu.dot_dimension_numbers<[1], [0], [0], [1], [0, 0, 1, 1], [], []>} : vector<2x32xf32>, vector<32x96xf32>, vector<2x96xf32> -> vector<2x96xf32>
    %103 = vector.broadcast %41 : vector<1x96xf32> to vector<2x96xf32>
    %104 = arith.addf %102, %103 : vector<2x96xf32>
    %105 = vector.extract_strided_slice %101 {offsets = [0, 0], sizes = [2, 64], strides = [1, 1]} : vector<2x96xf32> to vector<2x64xf32>
    %106 = vector.extract_strided_slice %104 {offsets = [0, 0], sizes = [2, 64], strides = [1, 1]} : vector<2x96xf32> to vector<2x64xf32>
    %107 = arith.addf %105, %106 : vector<2x64xf32>
    %108 = arith.negf %107 : vector<2x64xf32>
    %109 = math.exp %108 : vector<2x64xf32>
    %cst_45 = arith.constant 1.000000e+00 : f32
    %110 = vector.broadcast %cst_45 : f32 to vector<2x64xf32>
    %111 = arith.addf %110, %109 : vector<2x64xf32>
    %112 = arith.divf %110, %111 : vector<2x64xf32>
    %113 = vector.extract_strided_slice %112 {offsets = [0, 0], sizes = [2, 32], strides = [1, 1]} : vector<2x64xf32> to vector<2x32xf32>
    %114 = vector.extract_strided_slice %112 {offsets = [0, 32], sizes = [2, 32], strides = [1, 1]} : vector<2x64xf32> to vector<2x32xf32>
    %115 = vector.extract_strided_slice %101 {offsets = [0, 64], sizes = [2, 32], strides = [1, 1]} : vector<2x96xf32> to vector<2x32xf32>
    %116 = vector.extract_strided_slice %104 {offsets = [0, 64], sizes = [2, 32], strides = [1, 1]} : vector<2x96xf32> to vector<2x32xf32>
    %117 = arith.mulf %113, %116 : vector<2x32xf32>
    %118 = arith.addf %115, %117 : vector<2x32xf32>
    %119 = math.tanh %118 : vector<2x32xf32>
    %cst_46 = arith.constant 1.000000e+00 : f32
    %120 = vector.broadcast %cst_46 : f32 to vector<2x32xf32>
    %121 = arith.subf %120, %114 : vector<2x32xf32>
    %122 = arith.mulf %121, %119 : vector<2x32xf32>
    %123 = arith.mulf %114, %99 : vector<2x32xf32>
    %124 = arith.addf %122, %123 : vector<2x32xf32>
    %c4_47 = arith.constant 4 : index
    %c0_48 = arith.constant 0 : index
    %125 = vector.load %arg12[%c4_47, %c0_48] : memref<16x32xf32, #tpu.memory_space<vmem>>, vector<2x32xf32>
    tpu.vector_store %arg12[%c4_47, %c0_48], %124 {strides = array<i32>} : memref<16x32xf32, #tpu.memory_space<vmem>>, vector<2x32xf32>,
    %c6 = arith.constant 6 : index
    %c0_49 = arith.constant 0 : index
    %126 = vector.load %arg11[%c6, %c0_49] : memref<16x96xf32, #tpu.memory_space<vmem>>, vector<2x96xf32>
    %cst_50 = arith.constant dense<0.000000e+00> : vector<2x96xf32>
    %127 = tpu.matmul %124, %39, %cst_50 {dimension_numbers = #tpu.dot_dimension_numbers<[1], [0], [0], [1], [0, 0, 1, 1], [], []>} : vector<2x32xf32>, vector<32x96xf32>, vector<2x96xf32> -> vector<2x96xf32>
    %128 = vector.broadcast %41 : vector<1x96xf32> to vector<2x96xf32>
    %129 = arith.addf %127, %128 : vector<2x96xf32>
    %130 = vector.extract_strided_slice %126 {offsets = [0, 0], sizes = [2, 64], strides = [1, 1]} : vector<2x96xf32> to vector<2x64xf32>
    %131 = vector.extract_strided_slice %129 {offsets = [0, 0], sizes = [2, 64], strides = [1, 1]} : vector<2x96xf32> to vector<2x64xf32>
    %132 = arith.addf %130, %131 : vector<2x64xf32>
    %133 = arith.negf %132 : vector<2x64xf32>
    %134 = math.exp %133 : vector<2x64xf32>
    %cst_51 = arith.constant 1.000000e+00 : f32
    %135 = vector.broadcast %cst_51 : f32 to vector<2x64xf32>
    %136 = arith.addf %135, %134 : vector<2x64xf32>
    %137 = arith.divf %135, %136 : vector<2x64xf32>
    %138 = vector.extract_strided_slice %137 {offsets = [0, 0], sizes = [2, 32], strides = [1, 1]} : vector<2x64xf32> to vector<2x32xf32>
    %139 = vector.extract_strided_slice %137 {offsets = [0, 32], sizes = [2, 32], strides = [1, 1]} : vector<2x64xf32> to vector<2x32xf32>
    %140 = vector.extract_strided_slice %126 {offsets = [0, 64], sizes = [2, 32], strides = [1, 1]} : vector<2x96xf32> to vector<2x32xf32>
    %141 = vector.extract_strided_slice %129 {offsets = [0, 64], sizes = [2, 32], strides = [1, 1]} : vector<2x96xf32> to vector<2x32xf32>
    %142 = arith.mulf %138, %141 : vector<2x32xf32>
    %143 = arith.addf %140, %142 : vector<2x32xf32>
    %144 = math.tanh %143 : vector<2x32xf32>
    %cst_52 = arith.constant 1.000000e+00 : f32
    %145 = vector.broadcast %cst_52 : f32 to vector<2x32xf32>
    %146 = arith.subf %145, %139 : vector<2x32xf32>
    %147 = arith.mulf %146, %144 : vector<2x32xf32>
    %148 = arith.mulf %139, %124 : vector<2x32xf32>
    %149 = arith.addf %147, %148 : vector<2x32xf32>
    %c6_53 = arith.constant 6 : index
    %c0_54 = arith.constant 0 : index
    %150 = vector.load %arg12[%c6_53, %c0_54] : memref<16x32xf32, #tpu.memory_space<vmem>>, vector<2x32xf32>
    tpu.vector_store %arg12[%c6_53, %c0_54], %149 {strides = array<i32>} : memref<16x32xf32, #tpu.memory_space<vmem>>, vector<2x32xf32>,
    %c8 = arith.constant 8 : index
    %c0_55 = arith.constant 0 : index
    %151 = vector.load %arg11[%c8, %c0_55] : memref<16x96xf32, #tpu.memory_space<vmem>>, vector<2x96xf32>
    %cst_56 = arith.constant dense<0.000000e+00> : vector<2x96xf32>
    %152 = tpu.matmul %149, %39, %cst_56 {dimension_numbers = #tpu.dot_dimension_numbers<[1], [0], [0], [1], [0, 0, 1, 1], [], []>} : vector<2x32xf32>, vector<32x96xf32>, vector<2x96xf32> -> vector<2x96xf32>
    %153 = vector.broadcast %41 : vector<1x96xf32> to vector<2x96xf32>
    %154 = arith.addf %152, %153 : vector<2x96xf32>
    %155 = vector.extract_strided_slice %151 {offsets = [0, 0], sizes = [2, 64], strides = [1, 1]} : vector<2x96xf32> to vector<2x64xf32>
    %156 = vector.extract_strided_slice %154 {offsets = [0, 0], sizes = [2, 64], strides = [1, 1]} : vector<2x96xf32> to vector<2x64xf32>
    %157 = arith.addf %155, %156 : vector<2x64xf32>
    %158 = arith.negf %157 : vector<2x64xf32>
    %159 = math.exp %158 : vector<2x64xf32>
    %cst_57 = arith.constant 1.000000e+00 : f32
    %160 = vector.broadcast %cst_57 : f32 to vector<2x64xf32>
    %161 = arith.addf %160, %159 : vector<2x64xf32>
    %162 = arith.divf %160, %161 : vector<2x64xf32>
    %163 = vector.extract_strided_slice %162 {offsets = [0, 0], sizes = [2, 32], strides = [1, 1]} : vector<2x64xf32> to vector<2x32xf32>
    %164 = vector.extract_strided_slice %162 {offsets = [0, 32], sizes = [2, 32], strides = [1, 1]} : vector<2x64xf32> to vector<2x32xf32>
    %165 = vector.extract_strided_slice %151 {offsets = [0, 64], sizes = [2, 32], strides = [1, 1]} : vector<2x96xf32> to vector<2x32xf32>
    %166 = vector.extract_strided_slice %154 {offsets = [0, 64], sizes = [2, 32], strides = [1, 1]} : vector<2x96xf32> to vector<2x32xf32>
    %167 = arith.mulf %163, %166 : vector<2x32xf32>
    %168 = arith.addf %165, %167 : vector<2x32xf32>
    %169 = math.tanh %168 : vector<2x32xf32>
    %cst_58 = arith.constant 1.000000e+00 : f32
    %170 = vector.broadcast %cst_58 : f32 to vector<2x32xf32>
    %171 = arith.subf %170, %164 : vector<2x32xf32>
    %172 = arith.mulf %171, %169 : vector<2x32xf32>
    %173 = arith.mulf %164, %149 : vector<2x32xf32>
    %174 = arith.addf %172, %173 : vector<2x32xf32>
    %c8_59 = arith.constant 8 : index
    %c0_60 = arith.constant 0 : index
    %175 = vector.load %arg12[%c8_59, %c0_60] : memref<16x32xf32, #tpu.memory_space<vmem>>, vector<2x32xf32>
    tpu.vector_store %arg12[%c8_59, %c0_60], %174 {strides = array<i32>} : memref<16x32xf32, #tpu.memory_space<vmem>>, vector<2x32xf32>,
    %c10 = arith.constant 10 : index
    %c0_61 = arith.constant 0 : index
    %176 = vector.load %arg11[%c10, %c0_61] : memref<16x96xf32, #tpu.memory_space<vmem>>, vector<2x96xf32>
    %cst_62 = arith.constant dense<0.000000e+00> : vector<2x96xf32>
    %177 = tpu.matmul %174, %39, %cst_62 {dimension_numbers = #tpu.dot_dimension_numbers<[1], [0], [0], [1], [0, 0, 1, 1], [], []>} : vector<2x32xf32>, vector<32x96xf32>, vector<2x96xf32> -> vector<2x96xf32>
    %178 = vector.broadcast %41 : vector<1x96xf32> to vector<2x96xf32>
    %179 = arith.addf %177, %178 : vector<2x96xf32>
    %180 = vector.extract_strided_slice %176 {offsets = [0, 0], sizes = [2, 64], strides = [1, 1]} : vector<2x96xf32> to vector<2x64xf32>
    %181 = vector.extract_strided_slice %179 {offsets = [0, 0], sizes = [2, 64], strides = [1, 1]} : vector<2x96xf32> to vector<2x64xf32>
    %182 = arith.addf %180, %181 : vector<2x64xf32>
    %183 = arith.negf %182 : vector<2x64xf32>
    %184 = math.exp %183 : vector<2x64xf32>
    %cst_63 = arith.constant 1.000000e+00 : f32
    %185 = vector.broadcast %cst_63 : f32 to vector<2x64xf32>
    %186 = arith.addf %185, %184 : vector<2x64xf32>
    %187 = arith.divf %185, %186 : vector<2x64xf32>
    %188 = vector.extract_strided_slice %187 {offsets = [0, 0], sizes = [2, 32], strides = [1, 1]} : vector<2x64xf32> to vector<2x32xf32>
    %189 = vector.extract_strided_slice %187 {offsets = [0, 32], sizes = [2, 32], strides = [1, 1]} : vector<2x64xf32> to vector<2x32xf32>
    %190 = vector.extract_strided_slice %176 {offsets = [0, 64], sizes = [2, 32], strides = [1, 1]} : vector<2x96xf32> to vector<2x32xf32>
    %191 = vector.extract_strided_slice %179 {offsets = [0, 64], sizes = [2, 32], strides = [1, 1]} : vector<2x96xf32> to vector<2x32xf32>
    %192 = arith.mulf %188, %191 : vector<2x32xf32>
    %193 = arith.addf %190, %192 : vector<2x32xf32>
    %194 = math.tanh %193 : vector<2x32xf32>
    %cst_64 = arith.constant 1.000000e+00 : f32
    %195 = vector.broadcast %cst_64 : f32 to vector<2x32xf32>
    %196 = arith.subf %195, %189 : vector<2x32xf32>
    %197 = arith.mulf %196, %194 : vector<2x32xf32>
    %198 = arith.mulf %189, %174 : vector<2x32xf32>
    %199 = arith.addf %197, %198 : vector<2x32xf32>
    %c10_65 = arith.constant 10 : index
    %c0_66 = arith.constant 0 : index
    %200 = vector.load %arg12[%c10_65, %c0_66] : memref<16x32xf32, #tpu.memory_space<vmem>>, vector<2x32xf32>
    tpu.vector_store %arg12[%c10_65, %c0_66], %199 {strides = array<i32>} : memref<16x32xf32, #tpu.memory_space<vmem>>, vector<2x32xf32>,
    %c12 = arith.constant 12 : index
    %c0_67 = arith.constant 0 : index
    %201 = vector.load %arg11[%c12, %c0_67] : memref<16x96xf32, #tpu.memory_space<vmem>>, vector<2x96xf32>
    %cst_68 = arith.constant dense<0.000000e+00> : vector<2x96xf32>
    %202 = tpu.matmul %199, %39, %cst_68 {dimension_numbers = #tpu.dot_dimension_numbers<[1], [0], [0], [1], [0, 0, 1, 1], [], []>} : vector<2x32xf32>, vector<32x96xf32>, vector<2x96xf32> -> vector<2x96xf32>
    %203 = vector.broadcast %41 : vector<1x96xf32> to vector<2x96xf32>
    %204 = arith.addf %202, %203 : vector<2x96xf32>
    %205 = vector.extract_strided_slice %201 {offsets = [0, 0], sizes = [2, 64], strides = [1, 1]} : vector<2x96xf32> to vector<2x64xf32>
    %206 = vector.extract_strided_slice %204 {offsets = [0, 0], sizes = [2, 64], strides = [1, 1]} : vector<2x96xf32> to vector<2x64xf32>
    %207 = arith.addf %205, %206 : vector<2x64xf32>
    %208 = arith.negf %207 : vector<2x64xf32>
    %209 = math.exp %208 : vector<2x64xf32>
    %cst_69 = arith.constant 1.000000e+00 : f32
    %210 = vector.broadcast %cst_69 : f32 to vector<2x64xf32>
    %211 = arith.addf %210, %209 : vector<2x64xf32>
    %212 = arith.divf %210, %211 : vector<2x64xf32>
    %213 = vector.extract_strided_slice %212 {offsets = [0, 0], sizes = [2, 32], strides = [1, 1]} : vector<2x64xf32> to vector<2x32xf32>
    %214 = vector.extract_strided_slice %212 {offsets = [0, 32], sizes = [2, 32], strides = [1, 1]} : vector<2x64xf32> to vector<2x32xf32>
    %215 = vector.extract_strided_slice %201 {offsets = [0, 64], sizes = [2, 32], strides = [1, 1]} : vector<2x96xf32> to vector<2x32xf32>
    %216 = vector.extract_strided_slice %204 {offsets = [0, 64], sizes = [2, 32], strides = [1, 1]} : vector<2x96xf32> to vector<2x32xf32>
    %217 = arith.mulf %213, %216 : vector<2x32xf32>
    %218 = arith.addf %215, %217 : vector<2x32xf32>
    %219 = math.tanh %218 : vector<2x32xf32>
    %cst_70 = arith.constant 1.000000e+00 : f32
    %220 = vector.broadcast %cst_70 : f32 to vector<2x32xf32>
    %221 = arith.subf %220, %214 : vector<2x32xf32>
    %222 = arith.mulf %221, %219 : vector<2x32xf32>
    %223 = arith.mulf %214, %199 : vector<2x32xf32>
    %224 = arith.addf %222, %223 : vector<2x32xf32>
    %c12_71 = arith.constant 12 : index
    %c0_72 = arith.constant 0 : index
    %225 = vector.load %arg12[%c12_71, %c0_72] : memref<16x32xf32, #tpu.memory_space<vmem>>, vector<2x32xf32>
    tpu.vector_store %arg12[%c12_71, %c0_72], %224 {strides = array<i32>} : memref<16x32xf32, #tpu.memory_space<vmem>>, vector<2x32xf32>,
    %c14 = arith.constant 14 : index
    %c0_73 = arith.constant 0 : index
    %226 = vector.load %arg11[%c14, %c0_73] : memref<16x96xf32, #tpu.memory_space<vmem>>, vector<2x96xf32>
    %cst_74 = arith.constant dense<0.000000e+00> : vector<2x96xf32>
    %227 = tpu.matmul %224, %39, %cst_74 {dimension_numbers = #tpu.dot_dimension_numbers<[1], [0], [0], [1], [0, 0, 1, 1], [], []>} : vector<2x32xf32>, vector<32x96xf32>, vector<2x96xf32> -> vector<2x96xf32>
    %228 = vector.broadcast %41 : vector<1x96xf32> to vector<2x96xf32>
    %229 = arith.addf %227, %228 : vector<2x96xf32>
    %230 = vector.extract_strided_slice %226 {offsets = [0, 0], sizes = [2, 64], strides = [1, 1]} : vector<2x96xf32> to vector<2x64xf32>
    %231 = vector.extract_strided_slice %229 {offsets = [0, 0], sizes = [2, 64], strides = [1, 1]} : vector<2x96xf32> to vector<2x64xf32>
    %232 = arith.addf %230, %231 : vector<2x64xf32>
    %233 = arith.negf %232 : vector<2x64xf32>
    %234 = math.exp %233 : vector<2x64xf32>
    %cst_75 = arith.constant 1.000000e+00 : f32
    %235 = vector.broadcast %cst_75 : f32 to vector<2x64xf32>
    %236 = arith.addf %235, %234 : vector<2x64xf32>
    %237 = arith.divf %235, %236 : vector<2x64xf32>
    %238 = vector.extract_strided_slice %237 {offsets = [0, 0], sizes = [2, 32], strides = [1, 1]} : vector<2x64xf32> to vector<2x32xf32>
    %239 = vector.extract_strided_slice %237 {offsets = [0, 32], sizes = [2, 32], strides = [1, 1]} : vector<2x64xf32> to vector<2x32xf32>
    %240 = vector.extract_strided_slice %226 {offsets = [0, 64], sizes = [2, 32], strides = [1, 1]} : vector<2x96xf32> to vector<2x32xf32>
    %241 = vector.extract_strided_slice %229 {offsets = [0, 64], sizes = [2, 32], strides = [1, 1]} : vector<2x96xf32> to vector<2x32xf32>
    %242 = arith.mulf %238, %241 : vector<2x32xf32>
    %243 = arith.addf %240, %242 : vector<2x32xf32>
    %244 = math.tanh %243 : vector<2x32xf32>
    %cst_76 = arith.constant 1.000000e+00 : f32
    %245 = vector.broadcast %cst_76 : f32 to vector<2x32xf32>
    %246 = arith.subf %245, %239 : vector<2x32xf32>
    %247 = arith.mulf %246, %244 : vector<2x32xf32>
    %248 = arith.mulf %239, %224 : vector<2x32xf32>
    %249 = arith.addf %247, %248 : vector<2x32xf32>
    %c14_77 = arith.constant 14 : index
    %c0_78 = arith.constant 0 : index
    %250 = vector.load %arg12[%c14_77, %c0_78] : memref<16x32xf32, #tpu.memory_space<vmem>>, vector<2x32xf32>
    tpu.vector_store %arg12[%c14_77, %c0_78], %249 {strides = array<i32>} : memref<16x32xf32, #tpu.memory_space<vmem>>, vector<2x32xf32>,
    %c0_79 = arith.constant 0 : index
    %c0_80 = arith.constant 0 : index
    %251 = vector.load %arg12[%c0_79, %c0_80] : memref<16x32xf32, #tpu.memory_space<vmem>>, vector<16x32xf32>
    %c1 = arith.constant 1 : index
    %c0_81 = arith.constant 0 : index
    %c0_82 = arith.constant 0 : index
    %252 = vector.load %arg5[%c1, %c0_81, %c0_82] : memref<2x32x96xf32, #tpu.memory_space<vmem>>, vector<1x32x96xf32>
    %253 = vector.shape_cast %252 : vector<1x32x96xf32> to vector<32x96xf32>
    %c1_83 = arith.constant 1 : index
    %c0_84 = arith.constant 0 : index
    %c0_85 = arith.constant 0 : index
    %254 = vector.load %arg7[%c1_83, %c0_84, %c0_85] : memref<2x1x96xf32, #tpu.memory_space<vmem>>, vector<1x1x96xf32>
    %255 = vector.shape_cast %254 : vector<1x1x96xf32> to vector<1x96xf32>
    %c1_86 = arith.constant 1 : index
    %c0_87 = arith.constant 0 : index
    %c0_88 = arith.constant 0 : index
    %256 = vector.load %arg4[%c1_86, %c0_87, %c0_88] : memref<2x32x96xf32, #tpu.memory_space<vmem>>, vector<1x32x96xf32>
    %257 = vector.shape_cast %256 : vector<1x32x96xf32> to vector<32x96xf32>
    %cst_89 = arith.constant dense<0.000000e+00> : vector<16x96xf32>
    %258 = tpu.matmul %251, %257, %cst_89 {dimension_numbers = #tpu.dot_dimension_numbers<[1], [0], [0], [1], [0, 0, 1, 1], [], []>} : vector<16x32xf32>, vector<32x96xf32>, vector<16x96xf32> -> vector<16x96xf32>
    %c1_90 = arith.constant 1 : index
    %c0_91 = arith.constant 0 : index
    %c0_92 = arith.constant 0 : index
    %259 = vector.load %arg6[%c1_90, %c0_91, %c0_92] : memref<2x1x96xf32, #tpu.memory_space<vmem>>, vector<1x1x96xf32>
    %260 = vector.shape_cast %259 : vector<1x1x96xf32> to vector<1x96xf32>
    %261 = vector.broadcast %260 : vector<1x96xf32> to vector<16x96xf32>
    %262 = arith.addf %258, %261 : vector<16x96xf32>
    %c0_93 = arith.constant 0 : index
    %c0_94 = arith.constant 0 : index
    %263 = vector.load %arg11[%c0_93, %c0_94] : memref<16x96xf32, #tpu.memory_space<vmem>>, vector<16x96xf32>
    tpu.vector_store %arg11[%c0_93, %c0_94], %262 {strides = array<i32>} : memref<16x96xf32, #tpu.memory_space<vmem>>, vector<16x96xf32>,
    %cst_95 = arith.constant 0.000000e+00 : f32
    %264 = vector.broadcast %cst_95 : f32 to vector<2x32xf32>
    %c0_96 = arith.constant 0 : index
    %c0_97 = arith.constant 0 : index
    %265 = vector.load %arg11[%c0_96, %c0_97] : memref<16x96xf32, #tpu.memory_space<vmem>>, vector<2x96xf32>
    %cst_98 = arith.constant dense<0.000000e+00> : vector<2x96xf32>
    %266 = tpu.matmul %264, %253, %cst_98 {dimension_numbers = #tpu.dot_dimension_numbers<[1], [0], [0], [1], [0, 0, 1, 1], [], []>} : vector<2x32xf32>, vector<32x96xf32>, vector<2x96xf32> -> vector<2x96xf32>
    %267 = vector.broadcast %255 : vector<1x96xf32> to vector<2x96xf32>
    %268 = arith.addf %266, %267 : vector<2x96xf32>
    %269 = vector.extract_strided_slice %265 {offsets = [0, 0], sizes = [2, 64], strides = [1, 1]} : vector<2x96xf32> to vector<2x64xf32>
    %270 = vector.extract_strided_slice %268 {offsets = [0, 0], sizes = [2, 64], strides = [1, 1]} : vector<2x96xf32> to vector<2x64xf32>
    %271 = arith.addf %269, %270 : vector<2x64xf32>
    %272 = arith.negf %271 : vector<2x64xf32>
    %273 = math.exp %272 : vector<2x64xf32>
    %cst_99 = arith.constant 1.000000e+00 : f32
    %274 = vector.broadcast %cst_99 : f32 to vector<2x64xf32>
    %275 = arith.addf %274, %273 : vector<2x64xf32>
    %276 = arith.divf %274, %275 : vector<2x64xf32>
    %277 = vector.extract_strided_slice %276 {offsets = [0, 0], sizes = [2, 32], strides = [1, 1]} : vector<2x64xf32> to vector<2x32xf32>
    %278 = vector.extract_strided_slice %276 {offsets = [0, 32], sizes = [2, 32], strides = [1, 1]} : vector<2x64xf32> to vector<2x32xf32>
    %279 = vector.extract_strided_slice %265 {offsets = [0, 64], sizes = [2, 32], strides = [1, 1]} : vector<2x96xf32> to vector<2x32xf32>
    %280 = vector.extract_strided_slice %268 {offsets = [0, 64], sizes = [2, 32], strides = [1, 1]} : vector<2x96xf32> to vector<2x32xf32>
    %281 = arith.mulf %277, %280 : vector<2x32xf32>
    %282 = arith.addf %279, %281 : vector<2x32xf32>
    %283 = math.tanh %282 : vector<2x32xf32>
    %cst_100 = arith.constant 1.000000e+00 : f32
    %284 = vector.broadcast %cst_100 : f32 to vector<2x32xf32>
    %285 = arith.subf %284, %278 : vector<2x32xf32>
    %286 = arith.mulf %285, %283 : vector<2x32xf32>
    %287 = arith.mulf %278, %264 : vector<2x32xf32>
    %288 = arith.addf %286, %287 : vector<2x32xf32>
    %c2_101 = arith.constant 2 : index
    %c0_102 = arith.constant 0 : index
    %289 = vector.load %arg11[%c2_101, %c0_102] : memref<16x96xf32, #tpu.memory_space<vmem>>, vector<2x96xf32>
    %cst_103 = arith.constant dense<0.000000e+00> : vector<2x96xf32>
    %290 = tpu.matmul %288, %253, %cst_103 {dimension_numbers = #tpu.dot_dimension_numbers<[1], [0], [0], [1], [0, 0, 1, 1], [], []>} : vector<2x32xf32>, vector<32x96xf32>, vector<2x96xf32> -> vector<2x96xf32>
    %291 = vector.broadcast %255 : vector<1x96xf32> to vector<2x96xf32>
    %292 = arith.addf %290, %291 : vector<2x96xf32>
    %293 = vector.extract_strided_slice %289 {offsets = [0, 0], sizes = [2, 64], strides = [1, 1]} : vector<2x96xf32> to vector<2x64xf32>
    %294 = vector.extract_strided_slice %292 {offsets = [0, 0], sizes = [2, 64], strides = [1, 1]} : vector<2x96xf32> to vector<2x64xf32>
    %295 = arith.addf %293, %294 : vector<2x64xf32>
    %296 = arith.negf %295 : vector<2x64xf32>
    %297 = math.exp %296 : vector<2x64xf32>
    %cst_104 = arith.constant 1.000000e+00 : f32
    %298 = vector.broadcast %cst_104 : f32 to vector<2x64xf32>
    %299 = arith.addf %298, %297 : vector<2x64xf32>
    %300 = arith.divf %298, %299 : vector<2x64xf32>
    %301 = vector.extract_strided_slice %300 {offsets = [0, 0], sizes = [2, 32], strides = [1, 1]} : vector<2x64xf32> to vector<2x32xf32>
    %302 = vector.extract_strided_slice %300 {offsets = [0, 32], sizes = [2, 32], strides = [1, 1]} : vector<2x64xf32> to vector<2x32xf32>
    %303 = vector.extract_strided_slice %289 {offsets = [0, 64], sizes = [2, 32], strides = [1, 1]} : vector<2x96xf32> to vector<2x32xf32>
    %304 = vector.extract_strided_slice %292 {offsets = [0, 64], sizes = [2, 32], strides = [1, 1]} : vector<2x96xf32> to vector<2x32xf32>
    %305 = arith.mulf %301, %304 : vector<2x32xf32>
    %306 = arith.addf %303, %305 : vector<2x32xf32>
    %307 = math.tanh %306 : vector<2x32xf32>
    %cst_105 = arith.constant 1.000000e+00 : f32
    %308 = vector.broadcast %cst_105 : f32 to vector<2x32xf32>
    %309 = arith.subf %308, %302 : vector<2x32xf32>
    %310 = arith.mulf %309, %307 : vector<2x32xf32>
    %311 = arith.mulf %302, %288 : vector<2x32xf32>
    %312 = arith.addf %310, %311 : vector<2x32xf32>
    %c4_106 = arith.constant 4 : index
    %c0_107 = arith.constant 0 : index
    %313 = vector.load %arg11[%c4_106, %c0_107] : memref<16x96xf32, #tpu.memory_space<vmem>>, vector<2x96xf32>
    %cst_108 = arith.constant dense<0.000000e+00> : vector<2x96xf32>
    %314 = tpu.matmul %312, %253, %cst_108 {dimension_numbers = #tpu.dot_dimension_numbers<[1], [0], [0], [1], [0, 0, 1, 1], [], []>} : vector<2x32xf32>, vector<32x96xf32>, vector<2x96xf32> -> vector<2x96xf32>
    %315 = vector.broadcast %255 : vector<1x96xf32> to vector<2x96xf32>
    %316 = arith.addf %314, %315 : vector<2x96xf32>
    %317 = vector.extract_strided_slice %313 {offsets = [0, 0], sizes = [2, 64], strides = [1, 1]} : vector<2x96xf32> to vector<2x64xf32>
    %318 = vector.extract_strided_slice %316 {offsets = [0, 0], sizes = [2, 64], strides = [1, 1]} : vector<2x96xf32> to vector<2x64xf32>
    %319 = arith.addf %317, %318 : vector<2x64xf32>
    %320 = arith.negf %319 : vector<2x64xf32>
    %321 = math.exp %320 : vector<2x64xf32>
    %cst_109 = arith.constant 1.000000e+00 : f32
    %322 = vector.broadcast %cst_109 : f32 to vector<2x64xf32>
    %323 = arith.addf %322, %321 : vector<2x64xf32>
    %324 = arith.divf %322, %323 : vector<2x64xf32>
    %325 = vector.extract_strided_slice %324 {offsets = [0, 0], sizes = [2, 32], strides = [1, 1]} : vector<2x64xf32> to vector<2x32xf32>
    %326 = vector.extract_strided_slice %324 {offsets = [0, 32], sizes = [2, 32], strides = [1, 1]} : vector<2x64xf32> to vector<2x32xf32>
    %327 = vector.extract_strided_slice %313 {offsets = [0, 64], sizes = [2, 32], strides = [1, 1]} : vector<2x96xf32> to vector<2x32xf32>
    %328 = vector.extract_strided_slice %316 {offsets = [0, 64], sizes = [2, 32], strides = [1, 1]} : vector<2x96xf32> to vector<2x32xf32>
    %329 = arith.mulf %325, %328 : vector<2x32xf32>
    %330 = arith.addf %327, %329 : vector<2x32xf32>
    %331 = math.tanh %330 : vector<2x32xf32>
    %cst_110 = arith.constant 1.000000e+00 : f32
    %332 = vector.broadcast %cst_110 : f32 to vector<2x32xf32>
    %333 = arith.subf %332, %326 : vector<2x32xf32>
    %334 = arith.mulf %333, %331 : vector<2x32xf32>
    %335 = arith.mulf %326, %312 : vector<2x32xf32>
    %336 = arith.addf %334, %335 : vector<2x32xf32>
    %c6_111 = arith.constant 6 : index
    %c0_112 = arith.constant 0 : index
    %337 = vector.load %arg11[%c6_111, %c0_112] : memref<16x96xf32, #tpu.memory_space<vmem>>, vector<2x96xf32>
    %cst_113 = arith.constant dense<0.000000e+00> : vector<2x96xf32>
    %338 = tpu.matmul %336, %253, %cst_113 {dimension_numbers = #tpu.dot_dimension_numbers<[1], [0], [0], [1], [0, 0, 1, 1], [], []>} : vector<2x32xf32>, vector<32x96xf32>, vector<2x96xf32> -> vector<2x96xf32>
    %339 = vector.broadcast %255 : vector<1x96xf32> to vector<2x96xf32>
    %340 = arith.addf %338, %339 : vector<2x96xf32>
    %341 = vector.extract_strided_slice %337 {offsets = [0, 0], sizes = [2, 64], strides = [1, 1]} : vector<2x96xf32> to vector<2x64xf32>
    %342 = vector.extract_strided_slice %340 {offsets = [0, 0], sizes = [2, 64], strides = [1, 1]} : vector<2x96xf32> to vector<2x64xf32>
    %343 = arith.addf %341, %342 : vector<2x64xf32>
    %344 = arith.negf %343 : vector<2x64xf32>
    %345 = math.exp %344 : vector<2x64xf32>
    %cst_114 = arith.constant 1.000000e+00 : f32
    %346 = vector.broadcast %cst_114 : f32 to vector<2x64xf32>
    %347 = arith.addf %346, %345 : vector<2x64xf32>
    %348 = arith.divf %346, %347 : vector<2x64xf32>
    %349 = vector.extract_strided_slice %348 {offsets = [0, 0], sizes = [2, 32], strides = [1, 1]} : vector<2x64xf32> to vector<2x32xf32>
    %350 = vector.extract_strided_slice %348 {offsets = [0, 32], sizes = [2, 32], strides = [1, 1]} : vector<2x64xf32> to vector<2x32xf32>
    %351 = vector.extract_strided_slice %337 {offsets = [0, 64], sizes = [2, 32], strides = [1, 1]} : vector<2x96xf32> to vector<2x32xf32>
    %352 = vector.extract_strided_slice %340 {offsets = [0, 64], sizes = [2, 32], strides = [1, 1]} : vector<2x96xf32> to vector<2x32xf32>
    %353 = arith.mulf %349, %352 : vector<2x32xf32>
    %354 = arith.addf %351, %353 : vector<2x32xf32>
    %355 = math.tanh %354 : vector<2x32xf32>
    %cst_115 = arith.constant 1.000000e+00 : f32
    %356 = vector.broadcast %cst_115 : f32 to vector<2x32xf32>
    %357 = arith.subf %356, %350 : vector<2x32xf32>
    %358 = arith.mulf %357, %355 : vector<2x32xf32>
    %359 = arith.mulf %350, %336 : vector<2x32xf32>
    %360 = arith.addf %358, %359 : vector<2x32xf32>
    %c8_116 = arith.constant 8 : index
    %c0_117 = arith.constant 0 : index
    %361 = vector.load %arg11[%c8_116, %c0_117] : memref<16x96xf32, #tpu.memory_space<vmem>>, vector<2x96xf32>
    %cst_118 = arith.constant dense<0.000000e+00> : vector<2x96xf32>
    %362 = tpu.matmul %360, %253, %cst_118 {dimension_numbers = #tpu.dot_dimension_numbers<[1], [0], [0], [1], [0, 0, 1, 1], [], []>} : vector<2x32xf32>, vector<32x96xf32>, vector<2x96xf32> -> vector<2x96xf32>
    %363 = vector.broadcast %255 : vector<1x96xf32> to vector<2x96xf32>
    %364 = arith.addf %362, %363 : vector<2x96xf32>
    %365 = vector.extract_strided_slice %361 {offsets = [0, 0], sizes = [2, 64], strides = [1, 1]} : vector<2x96xf32> to vector<2x64xf32>
    %366 = vector.extract_strided_slice %364 {offsets = [0, 0], sizes = [2, 64], strides = [1, 1]} : vector<2x96xf32> to vector<2x64xf32>
    %367 = arith.addf %365, %366 : vector<2x64xf32>
    %368 = arith.negf %367 : vector<2x64xf32>
    %369 = math.exp %368 : vector<2x64xf32>
    %cst_119 = arith.constant 1.000000e+00 : f32
    %370 = vector.broadcast %cst_119 : f32 to vector<2x64xf32>
    %371 = arith.addf %370, %369 : vector<2x64xf32>
    %372 = arith.divf %370, %371 : vector<2x64xf32>
    %373 = vector.extract_strided_slice %372 {offsets = [0, 0], sizes = [2, 32], strides = [1, 1]} : vector<2x64xf32> to vector<2x32xf32>
    %374 = vector.extract_strided_slice %372 {offsets = [0, 32], sizes = [2, 32], strides = [1, 1]} : vector<2x64xf32> to vector<2x32xf32>
    %375 = vector.extract_strided_slice %361 {offsets = [0, 64], sizes = [2, 32], strides = [1, 1]} : vector<2x96xf32> to vector<2x32xf32>
    %376 = vector.extract_strided_slice %364 {offsets = [0, 64], sizes = [2, 32], strides = [1, 1]} : vector<2x96xf32> to vector<2x32xf32>
    %377 = arith.mulf %373, %376 : vector<2x32xf32>
    %378 = arith.addf %375, %377 : vector<2x32xf32>
    %379 = math.tanh %378 : vector<2x32xf32>
    %cst_120 = arith.constant 1.000000e+00 : f32
    %380 = vector.broadcast %cst_120 : f32 to vector<2x32xf32>
    %381 = arith.subf %380, %374 : vector<2x32xf32>
    %382 = arith.mulf %381, %379 : vector<2x32xf32>
    %383 = arith.mulf %374, %360 : vector<2x32xf32>
    %384 = arith.addf %382, %383 : vector<2x32xf32>
    %c10_121 = arith.constant 10 : index
    %c0_122 = arith.constant 0 : index
    %385 = vector.load %arg11[%c10_121, %c0_122] : memref<16x96xf32, #tpu.memory_space<vmem>>, vector<2x96xf32>
    %cst_123 = arith.constant dense<0.000000e+00> : vector<2x96xf32>
    %386 = tpu.matmul %384, %253, %cst_123 {dimension_numbers = #tpu.dot_dimension_numbers<[1], [0], [0], [1], [0, 0, 1, 1], [], []>} : vector<2x32xf32>, vector<32x96xf32>, vector<2x96xf32> -> vector<2x96xf32>
    %387 = vector.broadcast %255 : vector<1x96xf32> to vector<2x96xf32>
    %388 = arith.addf %386, %387 : vector<2x96xf32>
    %389 = vector.extract_strided_slice %385 {offsets = [0, 0], sizes = [2, 64], strides = [1, 1]} : vector<2x96xf32> to vector<2x64xf32>
    %390 = vector.extract_strided_slice %388 {offsets = [0, 0], sizes = [2, 64], strides = [1, 1]} : vector<2x96xf32> to vector<2x64xf32>
    %391 = arith.addf %389, %390 : vector<2x64xf32>
    %392 = arith.negf %391 : vector<2x64xf32>
    %393 = math.exp %392 : vector<2x64xf32>
    %cst_124 = arith.constant 1.000000e+00 : f32
    %394 = vector.broadcast %cst_124 : f32 to vector<2x64xf32>
    %395 = arith.addf %394, %393 : vector<2x64xf32>
    %396 = arith.divf %394, %395 : vector<2x64xf32>
    %397 = vector.extract_strided_slice %396 {offsets = [0, 0], sizes = [2, 32], strides = [1, 1]} : vector<2x64xf32> to vector<2x32xf32>
    %398 = vector.extract_strided_slice %396 {offsets = [0, 32], sizes = [2, 32], strides = [1, 1]} : vector<2x64xf32> to vector<2x32xf32>
    %399 = vector.extract_strided_slice %385 {offsets = [0, 64], sizes = [2, 32], strides = [1, 1]} : vector<2x96xf32> to vector<2x32xf32>
    %400 = vector.extract_strided_slice %388 {offsets = [0, 64], sizes = [2, 32], strides = [1, 1]} : vector<2x96xf32> to vector<2x32xf32>
    %401 = arith.mulf %397, %400 : vector<2x32xf32>
    %402 = arith.addf %399, %401 : vector<2x32xf32>
    %403 = math.tanh %402 : vector<2x32xf32>
    %cst_125 = arith.constant 1.000000e+00 : f32
    %404 = vector.broadcast %cst_125 : f32 to vector<2x32xf32>
    %405 = arith.subf %404, %398 : vector<2x32xf32>
    %406 = arith.mulf %405, %403 : vector<2x32xf32>
    %407 = arith.mulf %398, %384 : vector<2x32xf32>
    %408 = arith.addf %406, %407 : vector<2x32xf32>
    %c12_126 = arith.constant 12 : index
    %c0_127 = arith.constant 0 : index
    %409 = vector.load %arg11[%c12_126, %c0_127] : memref<16x96xf32, #tpu.memory_space<vmem>>, vector<2x96xf32>
    %cst_128 = arith.constant dense<0.000000e+00> : vector<2x96xf32>
    %410 = tpu.matmul %408, %253, %cst_128 {dimension_numbers = #tpu.dot_dimension_numbers<[1], [0], [0], [1], [0, 0, 1, 1], [], []>} : vector<2x32xf32>, vector<32x96xf32>, vector<2x96xf32> -> vector<2x96xf32>
    %411 = vector.broadcast %255 : vector<1x96xf32> to vector<2x96xf32>
    %412 = arith.addf %410, %411 : vector<2x96xf32>
    %413 = vector.extract_strided_slice %409 {offsets = [0, 0], sizes = [2, 64], strides = [1, 1]} : vector<2x96xf32> to vector<2x64xf32>
    %414 = vector.extract_strided_slice %412 {offsets = [0, 0], sizes = [2, 64], strides = [1, 1]} : vector<2x96xf32> to vector<2x64xf32>
    %415 = arith.addf %413, %414 : vector<2x64xf32>
    %416 = arith.negf %415 : vector<2x64xf32>
    %417 = math.exp %416 : vector<2x64xf32>
    %cst_129 = arith.constant 1.000000e+00 : f32
    %418 = vector.broadcast %cst_129 : f32 to vector<2x64xf32>
    %419 = arith.addf %418, %417 : vector<2x64xf32>
    %420 = arith.divf %418, %419 : vector<2x64xf32>
    %421 = vector.extract_strided_slice %420 {offsets = [0, 0], sizes = [2, 32], strides = [1, 1]} : vector<2x64xf32> to vector<2x32xf32>
    %422 = vector.extract_strided_slice %420 {offsets = [0, 32], sizes = [2, 32], strides = [1, 1]} : vector<2x64xf32> to vector<2x32xf32>
    %423 = vector.extract_strided_slice %409 {offsets = [0, 64], sizes = [2, 32], strides = [1, 1]} : vector<2x96xf32> to vector<2x32xf32>
    %424 = vector.extract_strided_slice %412 {offsets = [0, 64], sizes = [2, 32], strides = [1, 1]} : vector<2x96xf32> to vector<2x32xf32>
    %425 = arith.mulf %421, %424 : vector<2x32xf32>
    %426 = arith.addf %423, %425 : vector<2x32xf32>
    %427 = math.tanh %426 : vector<2x32xf32>
    %cst_130 = arith.constant 1.000000e+00 : f32
    %428 = vector.broadcast %cst_130 : f32 to vector<2x32xf32>
    %429 = arith.subf %428, %422 : vector<2x32xf32>
    %430 = arith.mulf %429, %427 : vector<2x32xf32>
    %431 = arith.mulf %422, %408 : vector<2x32xf32>
    %432 = arith.addf %430, %431 : vector<2x32xf32>
    %c14_131 = arith.constant 14 : index
    %c0_132 = arith.constant 0 : index
    %433 = vector.load %arg11[%c14_131, %c0_132] : memref<16x96xf32, #tpu.memory_space<vmem>>, vector<2x96xf32>
    %cst_133 = arith.constant dense<0.000000e+00> : vector<2x96xf32>
    %434 = tpu.matmul %432, %253, %cst_133 {dimension_numbers = #tpu.dot_dimension_numbers<[1], [0], [0], [1], [0, 0, 1, 1], [], []>} : vector<2x32xf32>, vector<32x96xf32>, vector<2x96xf32> -> vector<2x96xf32>
    %435 = vector.broadcast %255 : vector<1x96xf32> to vector<2x96xf32>
    %436 = arith.addf %434, %435 : vector<2x96xf32>
    %437 = vector.extract_strided_slice %433 {offsets = [0, 0], sizes = [2, 64], strides = [1, 1]} : vector<2x96xf32> to vector<2x64xf32>
    %438 = vector.extract_strided_slice %436 {offsets = [0, 0], sizes = [2, 64], strides = [1, 1]} : vector<2x96xf32> to vector<2x64xf32>
    %439 = arith.addf %437, %438 : vector<2x64xf32>
    %440 = arith.negf %439 : vector<2x64xf32>
    %441 = math.exp %440 : vector<2x64xf32>
    %cst_134 = arith.constant 1.000000e+00 : f32
    %442 = vector.broadcast %cst_134 : f32 to vector<2x64xf32>
    %443 = arith.addf %442, %441 : vector<2x64xf32>
    %444 = arith.divf %442, %443 : vector<2x64xf32>
    %445 = vector.extract_strided_slice %444 {offsets = [0, 0], sizes = [2, 32], strides = [1, 1]} : vector<2x64xf32> to vector<2x32xf32>
    %446 = vector.extract_strided_slice %444 {offsets = [0, 32], sizes = [2, 32], strides = [1, 1]} : vector<2x64xf32> to vector<2x32xf32>
    %447 = vector.extract_strided_slice %433 {offsets = [0, 64], sizes = [2, 32], strides = [1, 1]} : vector<2x96xf32> to vector<2x32xf32>
    %448 = vector.extract_strided_slice %436 {offsets = [0, 64], sizes = [2, 32], strides = [1, 1]} : vector<2x96xf32> to vector<2x32xf32>
    %449 = arith.mulf %445, %448 : vector<2x32xf32>
    %450 = arith.addf %447, %449 : vector<2x32xf32>
    %451 = math.tanh %450 : vector<2x32xf32>
    %cst_135 = arith.constant 1.000000e+00 : f32
    %452 = vector.broadcast %cst_135 : f32 to vector<2x32xf32>
    %453 = arith.subf %452, %446 : vector<2x32xf32>
    %454 = arith.mulf %453, %451 : vector<2x32xf32>
    %455 = arith.mulf %446, %432 : vector<2x32xf32>
    %456 = arith.addf %454, %455 : vector<2x32xf32>
    %c0_136 = arith.constant 0 : index
    %c0_137 = arith.constant 0 : index
    %457 = vector.load %arg8[%c0_136, %c0_137] : memref<32x2xf32, #tpu.memory_space<vmem>>, vector<32x2xf32>
    %cst_138 = arith.constant dense<0.000000e+00> : vector<2x2xf32>
    %458 = tpu.matmul %456, %457, %cst_138 {dimension_numbers = #tpu.dot_dimension_numbers<[1], [0], [0], [1], [0, 0, 1, 1], [], []>} : vector<2x32xf32>, vector<32x2xf32>, vector<2x2xf32> -> vector<2x2xf32>
    %c0_139 = arith.constant 0 : index
    %c0_140 = arith.constant 0 : index
    %459 = vector.load %arg9[%c0_139, %c0_140] : memref<1x2xf32, #tpu.memory_space<vmem>>, vector<1x2xf32>
    %460 = vector.broadcast %459 : vector<1x2xf32> to vector<2x2xf32>
    %461 = arith.addf %458, %460 : vector<2x2xf32>
    %c0_141 = arith.constant 0 : index
    %c0_142 = arith.constant 0 : index
    %462 = vector.load %arg10[%c0_141, %c0_142] : memref<2x2xf32, #tpu.memory_space<vmem>>, vector<2x2xf32>
    tpu.vector_store %arg10[%c0_141, %c0_142], %461 {strides = array<i32>} : memref<2x2xf32, #tpu.memory_space<vmem>>, vector<2x2xf32>,
    return
  }
}

</mosaic_0001>

<bundles_post_ra>
// kernel: attn_gru_forward.1
= control target key start
LH: loop header
LB: loop body
LE: loop exit
PB: predicated region body
PF: predicated region fallthrough
CT: control target
= control target key end

     0   :  { %v3174_v2 = vmov 0   ;;  %s3625_s0 = inlined_call_operand.vmem [shape: s32[16,1], index: 0, kind: input, shape index: {}]   ;;  %s3626_s1 = inlined_call_operand.vmem [shape: f32[100,32], index: 1, kind: input, shape index: {}]   ;;  %s3627_s2 = inlined_call_operand.vmem [shape: f32[32,96], index: 2, kind: input, shape index: {}]   ;;  %s3628_s3 = inlined_call_operand.vmem [shape: f32[1,96], index: 3, kind: input, shape index: {}]   ;;  %s3629_s4 = inlined_call_operand.vmem [shape: f32[2,32,96], index: 4, kind: input, shape index: {}]   ;;  %s3630_s5 = inlined_call_operand.vmem [shape: f32[2,32,96], index: 5, kind: input, shape index: {}]   ;;  %s3631_s6 = inlined_call_operand.vmem [shape: f32[2,1,96], index: 6, kind: input, shape index: {}]   ;;  %s3632_s7 = inlined_call_operand.vmem [shape: f32[2,1,96], index: 7, kind: input, shape index: {}]   ;;  %s3633_s8 = inlined_call_operand.vmem [shape: f32[32,2], index: 8, kind: input, shape index: {}]   ;;  %s3634_s9 = inlined_call_operand.vmem [shape: f32[1,2], index: 9, kind: input, shape index: {}]   ;;  %s3635_s10 = inlined_call_operand.hbm [shape: f32[2,2], index: 10, kind: output, shape index: {}]  }
   0x1   :  { %v36_v0 = vld [vmem:[%s3625_s0] sm:$0xff]  ;;  %3040 = vset.pattern.permute.xlu0 %v3174_v2  ;;  %v53_v3 = vld [vmem:[%s3626_s1 + $0x8] sm:$0xff]  ;;  %v54_v4 = vld [vmem:[%s3626_s1 + $0x10] sm:$0xff] }
   0x2   :  { %v52_v1 = vld [vmem:[%s3626_s1] sm:$0xff]  ;;  %v55_v5 = vld [vmem:[%s3626_s1 + $0x18] sm:$0xff]  ;;  %41 = vperm.xlu0 %3040, %v36_v0   ;;  %v37_v8 = vld [vmem:[%s3625_s0 + $0x8] sm:$0xff] }
   0x3   :  { %v2873_v6 = vpack.c.bf16 %v53_v3, %v52_v1  ;;  %v2877_v7 = vpack.c.bf16 %v55_v5, %v54_v4  ;;  %v56_v9 = vld [vmem:[%s3626_s1 + $0x20] sm:$0xff]  ;;  %v57_v10 = vld [vmem:[%s3626_s1 + $0x28] sm:$0xff] }
   0x5   :  { %2874 = vmatprep.subr.bf16.mxu0 %v2873_v6 }
   0x6   :  { %15 = vsyncpa [#allocation5], 0  ;;  %2876 = vmatpush3.bf16.msra.mxu0 %v2873_v6  ;;  %44 = vperm.xlu0 %3040, %v37_v8   ;;  %v2881_v11 = vpack.c.bf16 %v57_v10, %v56_v9  ;;  %v58_v12 = vld [vmem:[%s3626_s1 + $0x30] sm:$0xff]  ;;  %v59_v13 = vld [vmem:[%s3626_s1 + $0x38] sm:$0xff]  ;;  %vm72_vm0 = vcmask 1043456   ;;  %v38_v28 = vlaneseq  ;;  %vm65_vm1 = vcmask 818176  }
   0x7   :  { %2878 = vmatprep.subr.bf16.mxu0 %v2877_v7  ;;  %v151_v14 = vld [vmem:[%s3627_s2] sm:$0xff]  ;;  %v152_v15 = vld [vmem:[%s3627_s2 + $0x8] sm:$0xff]  ;;  %v153_v16 = vld [vmem:[%s3627_s2 + $0x10] sm:$0xff]  ;;  %v2885_v19 = vpack.c.bf16 %v59_v13, %v58_v12  ;;  %v3175_v31 = vmov 0.0   ;;  %vm162_vm4 = vcmask 261120   ;;  %s3176_s30 = smov 96  }
   0x8   :  { %v2897_v17 = vpack.c.bf16 %v152_v15, %v151_v14  ;;  %v154_v18 = vld [vmem:[%s3627_s2 + $0x18] sm:$0xff]  ;;  %v60_v21 = vld [vmem:[%s3626_s1 + $0x40] sm:$0xff]  ;;  %v61_v22 = vld [vmem:[%s3626_s1 + $0x48] sm:$0xff]  ;;  %v39_v29 = vand.u32 127, %v38_v28  ;;  %v336_v46 = vshrl.u32 %v38_v28, 7  ;;  %vm346_vm7 = vcmask 130048  }
   0x9   :  { %v2901_v20 = vpack.c.bf16 %v154_v18, %v153_v16  ;;  %v2889_v23 = vpack.c.bf16 %v61_v22, %v60_v21  ;;  %v62_v24 = vld [vmem:[%s3626_s1 + $0x50] sm:$0xff]  ;;  %v63_v25 = vld [vmem:[%s3626_s1 + $0x58] sm:$0xff]  ;;  %v64_v27 = vld [vmem:[%s3626_s1 + $0x60] sm:$0xf]  ;;  %v3178_v13 = vmov 0.0|0.0   ;;  %vm3179_vm9 = vmmov 0  }
   0xa   :  { %2880 = vmatpush3.bf16.msra.mxu0 %v2877_v7  ;;  %2898 = vmatprep.subr.bf16.mxu1 %v2897_v17  ;;  %v2893_v26 = vpack.c.bf16 %v63_v25, %v62_v24  ;;  %v2425_v37 = vld [vmem:[%s3628_s3] ss:$0 sm:$0xff]  ;;  %vm2906_vm5 = vmpackc.low %vm162_vm4, %vm162_vm4  ;;  %v337_v47 = vadd.s32 8, %v336_v46  ;;  %v338_v49 = vxor.u32 %v336_v46, %v39_v29  ;;  %s3177_s3 = smov 64   ;;  %v458_v12 = vld [vmem:[%s3630_s5 + $0x10] sm:$0xff]  ;;  %vm553_vm10 = vcmask 785408  }
   0xb   :  { %2882 = vmatprep.subr.bf16.mxu0 %v2881_v11  ;;  %2900 = vmatpush3.bf16.msra.mxu1 %v2897_v17  ;;  %v456_v10 = vld [vmem:[%s3630_s5] sm:$0xff]  ;;  %v459_v15 = vld [vmem:[%s3630_s5 + $0x18] sm:$0xff]  ;;  %v462_v17 = vld [vmem:[%s3629_s4 + $0x8] sm:$0xff]  ;;  %vm666_vm11 = vcmask 254976   ;;  %s3180_s11 = smov [#allocation4]   ;;  %vm2404_vm12 = vcmask 9216  }
   0xc   :  { %2902 = vmatprep.subr.bf16.mxu1 %v2901_v20  ;;  %v339_v48 = vxor.u32 %v337_v47, %v39_v29  ;;  %v340_v51 = vand.u32 1, %v338_v49  ;;  %v461_v16 = vld [vmem:[%s3629_s4] sm:$0xff]  ;;  %v463_v24 = vld [vmem:[%s3629_s4 + $0x10] sm:$0xff]  ;;  %v464_v25 = vld [vmem:[%s3629_s4 + $0x18] sm:$0xff]  ;;  %s2412_s0 = sshll.u32 %s3180_s11, 4  ;;  %s2413_s0 = int_to_ptr.vmem [resolvable:$true] %s2412_s0 }
   0xd   :  { %v2915_v18 = vpack.c.bf16 %v462_v17, %v461_v16  ;;  %v2919_v28 = vpack.c.bf16 %v464_v25, %v463_v24  ;;  %s3150_s12 = scalar_lea.vmem %s2413_s0, 32  ;;  %p3155_p1 = scmp.lt.s32.totalorder %s2413_s0, %s2413_s0 }
   0xe   :  { %2884 = vmatpush3.bf16.msra.mxu0 %v2881_v11  ;;  %v341_v50 = vand.u32 1, %v339_v48  ;;  %vm342_vm8 = vcmp.eq.s32.totalorder %v340_v51, 0  ;;  %v457_v11 = vld [vmem:[%s3630_s5 + $0x8] sm:$0xff]  ;;  %p3151_p0 = scmp.ne.s32.totalorder %s2413_s0, %s3150_s12  ;;  %p3156_p2 = scmp.lt.s32.totalorder %s3150_s12, %s3150_s12 }
   0xf   :  { %2886 = vmatprep.subr.bf16.mxu0 %v2885_v19  ;;  %2904 = vmatpush3.bf16.msra.mxu1 %v2901_v20  ;;  %v3321_v14 = vpack.c.bf16 %v457_v11, %v456_v10 }
  0x10   :  { %vm343_vm6 = vcmp.eq.s32.totalorder %v341_v50, 0  ;;  %p3157_p3 = por %p3156_p2, %p3155_p1 }
  0x12   :  { %2888 = vmatpush3.bf16.msra.mxu0 %v2885_v19  ;;  %v3335_v19 = vpack.c.bf16 %v459_v15, %v458_v12  ;;  %p3158_p4 = pnand %p3157_p3, %p3151_p0 }
  0x13   :  { %2890 = vmatprep.subr.bf16.mxu0 %v2889_v23 }
  0x16   :  { %2892 = vmatpush3.bf16.msra.mxu0 %v2889_v23 }
  0x17   :  { %2894 = vmatprep.subr.bf16.mxu0 %v2893_v26 }
  0x1a   :  { %2896 = vmatpush3.bf16.msra.mxu0 %v2893_v26 }
  0x1b   :  { %2634 = vmatprep.subr.msk.mxu0 %vm72_vm0, %v64_v27 }
  0x1e   :  { %2635 = vmatpush3.msk.msra.mxu0 %vm72_vm0, %v64_v27 }
  0x1f   :  { %2923 = vmatprep.subr.bf16.mxu0 %v3178_v13 }
  0x81   :  { %v42_v30 = vpop.permute.xlu0 %41 }
  0x82   :  { %vm46_vm2 = vcmp.eq.s32.totalorder %v42_v30, %v39_v29 }
  0x83   :  { %v2420_v32 = vsel %vm46_vm2, 1.0, %v3175_v31 }
  0x84   :  { %2636 = vmatprep.mubr.msk.f32.mxu0 %vm65_vm1, %v2420_v32 }
  0x85   :  { %v45_v33 = vpop.permute.xlu0 %44 }
  0x86   :  { %vm47_vm3 = vcmp.eq.s32.totalorder %v45_v33, %v39_v29  ;;  %v3359_v29 = vld [vmem:[%s3632_s7] ss:$0 sm:$0xff] }
  0x87   :  { %v2421_v34 = vsel %vm47_vm3, 1.0, %v3175_v31 }
  0x88   :  { %2637 = vmatmul.mubr.msk.f32.vlgmr.msra.gmra.mrb[0].mxu0 %vm65_vm1, %v2421_v34 }
  0x89   :  { %2683 = vmatprep.mubr.msk.f32.mxu0 %vm3179_vm9, %v3175_v31  ;;  %2925 = vmatpush3.bf16.msra.mxu0 %v3321_v14 }
  0x8a   :  { %2926 = vmatprep.subr.bf16.mxu0 %v3178_v13 }
  0x8d   :  { %2928 = vmatpush3.bf16.msra.mxu0 %v3335_v19 }
  0x8e   :  { %2935 = vmatprep.subr.bf16.mxu0 %v3178_v13 }
  0x90   :  { %2684 = vmatmul.mubr.f32.vlgmr.msra.gmra.mrb[2].mxu0 %v3175_v31 }
  0x91   :  { %2937 = vmatpush3.bf16.msra.mxu0 %v3321_v14  ;;  %2705 = vmatprep.mubr.msk.f32.mxu0 %vm3179_vm9, %v3175_v31 }
  0x92   :  { %2938 = vmatprep.subr.bf16.mxu0 %v3178_v13 }
  0x95   :  { %2940 = vmatpush3.bf16.msra.mxu0 %v3335_v19 }
  0x96   :  { %2947 = vmatprep.subr.bf16.mxu0 %v3178_v13 }
 0x15b   :  { %v2638_v35 = vpop.f32.mrb[0].mxu0 }
 0x15c   :  { %v142_v36 = vpop.f32.mrb[1].mxu0 }
 0x15d   :  { %2647 = vmatprep.mubr.msk.f32.mxu1 %vm162_vm4, %v142_v36  ;;  %v2434_v36 = vld [vmem:[%s3631_s6] ss:$0 sm:$0xff] }
 0x15e   :  { %2648 = vmatmul.mubr.msk.f32.vlgmr.msra.gmra.mrb[0].mxu1 %vm162_vm4, %v2638_v35 }
 0x163   :  { %v632_v30 = vpop.f32.mrb[2].mxu0 }
 0x164   :  { %v633_v32 = vadd.f32 %v3359_v29, %v632_v30  ;;  %v2685_v33 = vpop.f32.mrb[3].mxu0 }
 0x231   :  { %v2649_v38 = vpop.f32.mrb[0].mxu1 }
 0x232   :  { %v241_v39 = vadd.f32 %v2649_v38, %v2425_v37  ;;  %v235_v40 = vpop.f32.mrb[1].mxu1 }
 0x233   :  { %v236_v41 = vadd.f32 %v2425_v37, %v235_v40 }
 0x235   :  { %v2905_v42 = vpack.c.bf16 %v241_v39, %v236_v41  ;;  %246 = vrot.lane.b32.xlu1 %v236_v41, %s3176_s30  ;;  %v3041_v43 = vpack.i.bf16 %v241_v39, %v236_v41 }
 0x237   :  { %2907 = vmatprep.subr.msk.bf16.mxu1 %vm2906_vm5, %v2905_v42 }
 0x238   :  { %2910 = vmatpush3.bf16.xpose.msk.msra.mxu1 %vm2906_vm5, %v2905_v42 }
 0x239   :  { %248 = vrot.lane.b32.xlu1 %v241_v39, %s3176_s30 }
 0x2a7   :  { %v247_v44 = vpop.permute.xlu1 %246 }
 0x2a8   :  { %2654 = vmatprep.mubr.msk.f32.mxu1 %vm162_vm4, %v247_v44 }
 0x2ab   :  { %v249_v45 = vpop.permute.xlu1 %248 }
 0x2ac   :  { %2655 = vmatmul.mubr.msk.f32.vlgmr.msra.gmra.mrb[2].mxu1 %vm162_vm4, %v249_v45 }
 0x37f   :  { %v2656_v52 = vpop.f32.mrb[2].mxu1 }
 0x380   :  { %v334_v53 = vmul.f32 0.17677669, %v2656_v52  ;;  %v324_v54 = vpop.f32.mrb[3].mxu1 }
 0x381   :  { %v333_v55 = vmul.f32 0.17677669, %v324_v54 }
 0x382   :  { %v345_v56 = vsel %vm343_vm6, %v334_v53, -1e+30 }
 0x383   :  { %v350_v57 = vsel %vm346_vm7, %v345_v56, -inf  ;;  %v344_v58 = vsel %vm342_vm8, %v333_v55, -1e+30 }
 0x384   :  { %351 = vmax.xlane.f32.xlu1 %v350_v57  ;;  %v347_v59 = vsel %vm346_vm7, %v344_v58, -inf }
 0x385   :  { %348 = vmax.xlane.f32.xlu0 %v347_v59 }
 0x395   :  { %3042 = vrot.lane.b32.xlu1 %v3041_v43, %s3177_s3 }
 0x411   :  { %v352_v60 = vpop.xlane.xlu1 %351 }
 0x412   :  { %v354_v61 = vsub.f32 %v345_v56, %v352_v60  ;;  %v349_v62 = vpop.xlane.xlu0 %348 }
 0x413   :  { %v353_v63 = vsub.f32 %v344_v58, %v349_v62 }
 0x414   :  { %v357_v0 = vmul.f32 1.442695, %v354_v61 }
 0x415   :  { %v355_v1 = vmul.f32 1.442695, %v353_v63  ;;  %v3043_v2 = vpop.permute.xlu1 %3042 }
 0x416   :  { %v3045_v3 = vunpack.i.h.bf16 %v3043_v2  ;;  %v3044_v4 = vunpack.i.l.bf16 %v3043_v2 }
 0x417   :  { %3046 = vpow2.f32 %v355_v1 }
 0x418   :  { %v2911_v5 = vpack.c.bf16 %v3045_v3, %v3044_v4  ;;  %3048 = vpow2.f32 %v357_v0 }
 0x41a   :  { %2912 = vmatprep.subr.bf16.mxu1 %v2911_v5 }
 0x41b   :  { %2914 = vmatpush3.bf16.msra.mxu1 %v2911_v5 }
 0x41c   :  { %2916 = vmatprep.subr.bf16.mxu1 %v2915_v18 }
 0x421   :  { %v3047_v6 = vpop.eup %3046 }
 0x422   :  { %v359_v7 = vsel %vm346_vm7, %v3047_v6, 0.0  ;;  %v3049_v8 = vpop.eup %3048 }
 0x423   :  { %360 = vadd.xlane.f32.xlu0 %v359_v7  ;;  %v362_v9 = vsel %vm346_vm7, %v3049_v8, 0.0 }
 0x427   :  { %363 = vadd.xlane.f32.xlu0 %v362_v9 }
 0x43d   :  { %644 = vrot.lane.b32.xlu0 %v633_v32, %s3177_s3 }
 0x4b0   :  { %v361_v20 = vpop.xlane.xlu0 %360 }
 0x4b1   :  { %3050 = vrcp.f32 %v361_v20 }
 0x4b4   :  { %v364_v21 = vpop.xlane.xlu0 %363 }
 0x4b5   :  { %3052 = vrcp.f32 %v364_v21 }
 0x4b8   :  { %v645_v46 = vpop.permute.xlu0 %644 }
 0x4bb   :  { %v3051_v22 = vpop.eup %3050 }
 0x4bc   :  { %v366_v23 = vmul.f32 %v3051_v22, %v3047_v6 }
 0x4be   :  { %2661 = vmatprep.mubr.msk.f32.mxu1 %vm346_vm7, %v366_v23 }
 0x4bf   :  { %v3053_v26 = vpop.eup %3052 }
 0x4c0   :  { %v368_v27 = vmul.f32 %v3053_v26, %v3049_v8 }
 0x4c2   :  { %2662 = vmatmul.mubr.msk.f32.vlgmr.msra.gmra.mrb[4].mxu1 %vm346_vm7, %v368_v27 }
 0x4c3   :  { %2918 = vmatpush3.bf16.msra.mxu1 %v2915_v18 }
 0x4c4   :  { %2920 = vmatprep.subr.bf16.mxu1 %v2919_v28 }
 0x4c7   :  { %2922 = vmatpush3.bf16.msra.mxu1 %v2919_v28 }
 0x4c8   :  { %2929 = vmatprep.subr.bf16.mxu1 %v3178_v13 }
 0x595   :  { %v2663_v34 = vpop.f32.mrb[4].mxu1 }
 0x596   :  { %v447_v35 = vpop.f32.mrb[5].mxu1 }
 0x597   :  { %2672 = vmatprep.mubr.msk.f32.mxu1 %vm162_vm4, %v447_v35 }
 0x598   :  { %2673 = vmatmul.mubr.msk.f32.vlgmr.msra.gmra.mrb[6].mxu1 %vm162_vm4, %v2663_v34 }
 0x599   :  { %2931 = vmatpush3.bf16.msra.mxu1 %v3321_v14  ;;  %2694 = vmatprep.mubr.msk.f32.mxu1 %vm3179_vm9, %v3175_v31 }
 0x59a   :  { %2932 = vmatprep.subr.bf16.mxu1 %v3178_v13 }
 0x59d   :  { %2934 = vmatpush3.bf16.msra.mxu1 %v3335_v19 }
 0x59e   :  { %2941 = vmatprep.subr.bf16.mxu1 %v3178_v13 }
 0x66b   :  { %v2674_v37 = vpop.f32.mrb[6].mxu1 }
 0x66c   :  { %v550_v38 = vadd.f32 %v2674_v37, %v2434_v36  ;;  %v544_v39 = vpop.f32.mrb[7].mxu1 }
 0x66d   :  { %v545_v40 = vadd.f32 %v2434_v36, %v544_v39 }
 0x66e   :  { %555 = vst.msk [vmem:[#allocation2 + $0x8] sm:$0xff] %vm553_vm10, %v550_v38 }
 0x66f   :  { %554 = vst.msk [vmem:[#allocation2] sm:$0xff] %vm553_vm10, %v545_v40 }
 0x676   :  { %v556_v41 = vld [vmem:[#allocation2] sm:$0x3]  ;;  %v668_v61 = vld [vmem:[#allocation2 + $0x2] sm:$0x3]  ;;  %v772_v20 = vld [vmem:[#allocation2 + $0x4] sm:$0x3] }
 0x677   :  { %v636_v42 = vadd.f32 %v633_v32, %v556_v41 }
 0x679   :  { %v2438_v43 = vmul.f32 -1.442695, %v636_v42  ;;  %v876_v42 = vld [vmem:[#allocation2 + $0x6] sm:$0x3] }
 0x67b   :  { %3054 = vpow2.f32 %v2438_v43 }
 0x685   :  { %v3055_v44 = vpop.eup %3054 }
 0x686   :  { %v640_v45 = vadd.f32 1.0, %v3055_v44 }
 0x688   :  { %3056 = vrcp.f32 %v640_v45 }
 0x692   :  { %v3057_v47 = vpop.eup %3056 }
 0x693   :  { %v647_v48 = vmul.f32 %v3057_v47, %v645_v46  ;;  %v654_v52 = vsub.f32 1.0, %v3057_v47  ;;  %v660_v54 = vmul.f32 0.0, %v3057_v47 }
 0x695   :  { %649 = vrot.lane.b32.xlu1 %v647_v48, %s3177_s3 }
 0x707   :  { %v650_v49 = vpop.permute.xlu1 %649 }
 0x708   :  { %v652_v50 = vadd.f32 %v650_v49, %v556_v41 }
 0x70a   :  { %3058 = vtanh.f32 %v652_v50 }
 0x714   :  { %v3059_v51 = vpop.eup %3058 }
 0x715   :  { %656 = vrot.lane.b32.xlu1 %v3059_v51, %s3176_s30 }
 0x787   :  { %v657_v53 = vpop.permute.xlu1 %656 }
 0x788   :  { %v659_v55 = vmul.f32 %v657_v53, %v654_v52 }
 0x78a   :  { %v661_v56 = vadd.f32 %v660_v54, %v659_v55 }
 0x78c   :  { %663 = vrot.lane.b32.xlu0 %v661_v56, %s3176_s30 }
 0x7fe   :  { %v664_v57 = vpop.permute.xlu0 %663 }
 0x7ff   :  { %667 = vst.msk [vmem:[#allocation3] sm:$0x3] %vm666_vm11, %v664_v57  ;;  %2695 = vmatmul.mubr.msk.f32.vlgmr.msra.gmra.mrb[8].mxu1 %vm162_vm4, %v664_v57 }
 0x800   :  { %2943 = vmatpush3.bf16.msra.mxu1 %v3321_v14  ;;  %2716 = vmatprep.mubr.msk.f32.mxu1 %vm3179_vm9, %v3175_v31 }
 0x801   :  { %2944 = vmatprep.subr.bf16.mxu1 %v3178_v13 }
 0x804   :  { %2946 = vmatpush3.bf16.msra.mxu1 %v3335_v19 }
 0x805   :  { %2953 = vmatprep.subr.bf16.mxu1 %v3178_v13 }
 0x8d2   :  { %v737_v58 = vpop.f32.mrb[8].mxu1 }
 0x8d3   :  { %v738_v59 = vadd.f32 %v3359_v29, %v737_v58  ;;  %v2696_v60 = vpop.f32.mrb[9].mxu1 }
 0x8d5   :  { %749 = vrot.lane.b32.xlu1 %v738_v59, %s3177_s3  ;;  %v741_v62 = vadd.f32 %v738_v59, %v668_v61 }
 0x8d7   :  { %v2440_v63 = vmul.f32 -1.442695, %v741_v62  ;;  %v980_v62 = vld [vmem:[#allocation2 + $0x8] sm:$0x3] }
 0x8d9   :  { %3060 = vpow2.f32 %v2440_v63 }
 0x8e3   :  { %v3061_v0 = vpop.eup %3060 }
 0x8e4   :  { %v745_v1 = vadd.f32 1.0, %v3061_v0 }
 0x8e6   :  { %3062 = vrcp.f32 %v745_v1 }
 0x8f0   :  { %v3063_v2 = vpop.eup %3062 }
 0x8f1   :  { %v759_v8 = vsub.f32 1.0, %v3063_v2  ;;  %v765_v10 = vmul.f32 %v3063_v2, %v661_v56 }
 0x947   :  { %v750_v3 = vpop.permute.xlu1 %749 }
 0x948   :  { %v752_v4 = vmul.f32 %v3063_v2, %v750_v3 }
 0x94a   :  { %754 = vrot.lane.b32.xlu0 %v752_v4, %s3177_s3 }
 0x9bc   :  { %v755_v5 = vpop.permute.xlu0 %754 }
 0x9bd   :  { %v757_v6 = vadd.f32 %v755_v5, %v668_v61 }
 0x9bf   :  { %3064 = vtanh.f32 %v757_v6 }
 0x9c9   :  { %v3065_v7 = vpop.eup %3064 }
 0x9ca   :  { %761 = vrot.lane.b32.xlu1 %v3065_v7, %s3176_s30 }
 0xa3c   :  { %v762_v9 = vpop.permute.xlu1 %761 }
 0xa3d   :  { %v764_v11 = vmul.f32 %v762_v9, %v759_v8 }
 0xa3f   :  { %v766_v12 = vadd.f32 %v765_v10, %v764_v11 }
 0xa41   :  { %768 = vrot.lane.b32.xlu0 %v766_v12, %s3176_s30 }
 0xab3   :  { %v769_v15 = vpop.permute.xlu0 %768 }
 0xab4   :  { %771 = vst.msk [vmem:[#allocation3 + $0x2] sm:$0x3] %vm666_vm11, %v769_v15  ;;  %2706 = vmatmul.mubr.msk.f32.vlgmr.msra.gmra.mrb[4].mxu0 %vm162_vm4, %v769_v15 }
 0xab5   :  { %2949 = vmatpush3.bf16.msra.mxu0 %v3321_v14  ;;  %2727 = vmatprep.mubr.msk.f32.mxu0 %vm3179_vm9, %v3175_v31 }
 0xab6   :  { %2950 = vmatprep.subr.bf16.mxu0 %v3178_v13 }
 0xab9   :  { %2952 = vmatpush3.bf16.msra.mxu0 %v3335_v19 }
 0xaba   :  { %2959 = vmatprep.subr.bf16.mxu0 %v3178_v13 }
 0xb87   :  { %v841_v16 = vpop.f32.mrb[4].mxu0 }
 0xb88   :  { %v842_v17 = vadd.f32 %v3359_v29, %v841_v16  ;;  %v2707_v18 = vpop.f32.mrb[5].mxu0 }
 0xb8a   :  { %853 = vrot.lane.b32.xlu1 %v842_v17, %s3177_s3  ;;  %v845_v21 = vadd.f32 %v842_v17, %v772_v20 }
 0xb8c   :  { %v2442_v22 = vmul.f32 -1.442695, %v845_v21  ;;  %v1084_v21 = vld [vmem:[#allocation2 + $0xa] sm:$0x3] }
 0xb8e   :  { %3066 = vpow2.f32 %v2442_v22 }
 0xb98   :  { %v3067_v23 = vpop.eup %3066 }
 0xb99   :  { %v849_v24 = vadd.f32 1.0, %v3067_v23 }
 0xb9b   :  { %3068 = vrcp.f32 %v849_v24 }
 0xba5   :  { %v3069_v25 = vpop.eup %3068 }
 0xba6   :  { %v863_v33 = vsub.f32 1.0, %v3069_v25  ;;  %v869_v35 = vmul.f32 %v3069_v25, %v766_v12 }
 0xbfc   :  { %v854_v26 = vpop.permute.xlu1 %853 }
 0xbfd   :  { %v856_v27 = vmul.f32 %v3069_v25, %v854_v26 }
 0xbff   :  { %858 = vrot.lane.b32.xlu0 %v856_v27, %s3177_s3 }
 0xc71   :  { %v859_v28 = vpop.permute.xlu0 %858 }
 0xc72   :  { %v861_v30 = vadd.f32 %v859_v28, %v772_v20 }
 0xc74   :  { %3070 = vtanh.f32 %v861_v30 }
 0xc7e   :  { %v3071_v32 = vpop.eup %3070 }
 0xc7f   :  { %865 = vrot.lane.b32.xlu1 %v3071_v32, %s3176_s30 }
 0xcf1   :  { %v866_v34 = vpop.permute.xlu1 %865 }
 0xcf2   :  { %v868_v36 = vmul.f32 %v866_v34, %v863_v33 }
 0xcf4   :  { %v870_v37 = vadd.f32 %v869_v35, %v868_v36 }
 0xcf6   :  { %872 = vrot.lane.b32.xlu0 %v870_v37, %s3176_s30 }
 0xd68   :  { %v873_v38 = vpop.permute.xlu0 %872 }
 0xd69   :  { %875 = vst.msk [vmem:[#allocation3 + $0x4] sm:$0x3] %vm666_vm11, %v873_v38  ;;  %2717 = vmatmul.mubr.msk.f32.vlgmr.msra.gmra.mrb[10].mxu1 %vm162_vm4, %v873_v38 }
 0xd6a   :  { %2955 = vmatpush3.bf16.msra.mxu1 %v3321_v14  ;;  %2738 = vmatprep.mubr.msk.f32.mxu1 %vm3179_vm9, %v3175_v31 }
 0xd6b   :  { %2956 = vmatprep.subr.bf16.mxu1 %v3178_v13 }
 0xd6e   :  { %2958 = vmatpush3.bf16.msra.mxu1 %v3335_v19 }
 0xd6f   :  { %2965 = vmatprep.subr.bf16.mxu1 %v3178_v13 }
 0xe3c   :  { %v945_v39 = vpop.f32.mrb[10].mxu1 }
 0xe3d   :  { %v946_v40 = vadd.f32 %v3359_v29, %v945_v39  ;;  %v2718_v41 = vpop.f32.mrb[11].mxu1 }
 0xe3f   :  { %957 = vrot.lane.b32.xlu1 %v946_v40, %s3177_s3  ;;  %v949_v43 = vadd.f32 %v946_v40, %v876_v42 }
 0xe41   :  { %v2444_v44 = vmul.f32 -1.442695, %v949_v43 }
 0xe43   :  { %3072 = vpow2.f32 %v2444_v44 }
 0xe4d   :  { %v3073_v45 = vpop.eup %3072 }
 0xe4e   :  { %v953_v46 = vadd.f32 1.0, %v3073_v45 }
 0xe50   :  { %3074 = vrcp.f32 %v953_v46 }
 0xe5a   :  { %v3075_v47 = vpop.eup %3074 }
 0xe5b   :  { %v967_v53 = vsub.f32 1.0, %v3075_v47  ;;  %v973_v55 = vmul.f32 %v3075_v47, %v870_v37 }
 0xeb1   :  { %v958_v48 = vpop.permute.xlu1 %957 }
 0xeb2   :  { %v960_v49 = vmul.f32 %v3075_v47, %v958_v48 }
 0xeb4   :  { %962 = vrot.lane.b32.xlu0 %v960_v49, %s3177_s3 }
 0xf26   :  { %v963_v50 = vpop.permute.xlu0 %962 }
 0xf27   :  { %v965_v51 = vadd.f32 %v963_v50, %v876_v42  ;;  %v1188_v42 = vld [vmem:[#allocation2 + $0xc] sm:$0x3] }
 0xf29   :  { %3076 = vtanh.f32 %v965_v51 }
 0xf33   :  { %v3077_v52 = vpop.eup %3076 }
 0xf34   :  { %969 = vrot.lane.b32.xlu1 %v3077_v52, %s3176_s30 }
 0xfa6   :  { %v970_v54 = vpop.permute.xlu1 %969 }
 0xfa7   :  { %v972_v56 = vmul.f32 %v970_v54, %v967_v53 }
 0xfa9   :  { %v974_v57 = vadd.f32 %v973_v55, %v972_v56 }
 0xfab   :  { %976 = vrot.lane.b32.xlu0 %v974_v57, %s3176_s30 }
0x101d   :  { %v977_v58 = vpop.permute.xlu0 %976 }
0x101e   :  { %979 = vst.msk [vmem:[#allocation3 + $0x6] sm:$0x3] %vm666_vm11, %v977_v58  ;;  %2728 = vmatmul.mubr.msk.f32.vlgmr.msra.gmra.mrb[6].mxu0 %vm162_vm4, %v977_v58 }
0x101f   :  { %2961 = vmatpush3.bf16.msra.mxu0 %v3321_v14  ;;  %2749 = vmatprep.mubr.msk.f32.mxu0 %vm3179_vm9, %v3175_v31 }
0x1020   :  { %2962 = vmatprep.subr.bf16.mxu0 %v3178_v13 }
0x1023   :  { %2964 = vmatpush3.bf16.msra.mxu0 %v3335_v19 }
0x1025   :  { %v1396_v38 = vld [vmem:[#allocation3] sm:$0xff] }
0x10f1   :  { %v1049_v59 = vpop.f32.mrb[6].mxu0 }
0x10f2   :  { %v1050_v60 = vadd.f32 %v3359_v29, %v1049_v59  ;;  %v2729_v61 = vpop.f32.mrb[7].mxu0 }
0x10f4   :  { %1061 = vrot.lane.b32.xlu1 %v1050_v60, %s3177_s3  ;;  %v1053_v63 = vadd.f32 %v1050_v60, %v980_v62 }
0x10f6   :  { %v2446_v0 = vmul.f32 -1.442695, %v1053_v63 }
0x10f8   :  { %3078 = vpow2.f32 %v2446_v0 }
0x1102   :  { %v3079_v1 = vpop.eup %3078 }
0x1103   :  { %v1057_v2 = vadd.f32 1.0, %v3079_v1 }
0x1105   :  { %3080 = vrcp.f32 %v1057_v2 }
0x110f   :  { %v3081_v3 = vpop.eup %3080 }
0x1110   :  { %v1071_v9 = vsub.f32 1.0, %v3081_v3  ;;  %v1077_v11 = vmul.f32 %v3081_v3, %v974_v57 }
0x1166   :  { %v1062_v4 = vpop.permute.xlu1 %1061 }
0x1167   :  { %v1064_v5 = vmul.f32 %v3081_v3, %v1062_v4 }
0x1169   :  { %1066 = vrot.lane.b32.xlu0 %v1064_v5, %s3177_s3 }
0x11db   :  { %v1067_v6 = vpop.permute.xlu0 %1066 }
0x11dc   :  { %v1069_v7 = vadd.f32 %v1067_v6, %v980_v62  ;;  %v1292_v62 = vld [vmem:[#allocation2 + $0xe] sm:$0x3] }
0x11de   :  { %3082 = vtanh.f32 %v1069_v7 }
0x11e8   :  { %v3083_v8 = vpop.eup %3082 }
0x11e9   :  { %1073 = vrot.lane.b32.xlu1 %v3083_v8, %s3176_s30  ;;  %v2454_v8 = vld [vmem:[%s3630_s5 + $0x28] sm:$0xff] }
0x125b   :  { %v1074_v10 = vpop.permute.xlu1 %1073 }
0x125c   :  { %v1076_v12 = vmul.f32 %v1074_v10, %v1071_v9  ;;  %v2455_v9 = vld [vmem:[%s3630_s5 + $0x30] sm:$0xff] }
0x125e   :  { %v1078_v15 = vadd.f32 %v1077_v11, %v1076_v12  ;;  %v2456_v11 = vld [vmem:[%s3630_s5 + $0x38] sm:$0xff] }
0x125f   :  { %v3473_v12 = vpack.c.bf16 %v2456_v11, %v2455_v9 }
0x1260   :  { %1080 = vrot.lane.b32.xlu0 %v1078_v15, %s3176_s30 }
0x12d2   :  { %v1081_v16 = vpop.permute.xlu0 %1080 }
0x12d3   :  { %1083 = vst.msk [vmem:[#allocation3 + $0x8] sm:$0x3] %vm666_vm11, %v1081_v16  ;;  %2739 = vmatmul.mubr.msk.f32.vlgmr.msra.gmra.mrb[12].mxu1 %vm162_vm4, %v1081_v16  ;;  %v2458_v16 = vld [vmem:[%s3629_s4 + $0x20] sm:$0xff] }
0x12d4   :  { %2967 = vmatpush3.bf16.msra.mxu1 %v3321_v14  ;;  %2760 = vmatprep.mubr.msk.f32.mxu1 %vm3179_vm9, %v3175_v31 }
0x12d5   :  { %2968 = vmatprep.subr.bf16.mxu1 %v3178_v13 }
0x12d8   :  { %2970 = vmatpush3.bf16.msra.mxu1 %v3335_v19 }
0x12d9   :  { %2979 = vmatprep.subr.bf16.mxu1 %v3178_v13 }
0x13a6   :  { %v1153_v17 = vpop.f32.mrb[12].mxu1 }
0x13a7   :  { %v1154_v18 = vadd.f32 %v3359_v29, %v1153_v17  ;;  %v2740_v20 = vpop.f32.mrb[13].mxu1  ;;  %v2459_v17 = vld [vmem:[%s3629_s4 + $0x28] sm:$0xff] }
0x13a8   :  { %v2460_v20 = vld [vmem:[%s3629_s4 + $0x30] sm:$0xff] }
0x13a9   :  { %1165 = vrot.lane.b32.xlu1 %v1154_v18, %s3177_s3  ;;  %v1157_v22 = vadd.f32 %v1154_v18, %v1084_v21  ;;  %v2971_v18 = vpack.c.bf16 %v2459_v17, %v2458_v16 }
0x13ab   :  { %v2448_v23 = vmul.f32 -1.442695, %v1157_v22  ;;  %2972 = vmatprep.subr.bf16.mxu0 %v2971_v18 }
0x13ad   :  { %3084 = vpow2.f32 %v2448_v23 }
0x13b7   :  { %v3085_v14 = vpop.eup %3084 }
0x13b8   :  { %v1161_v24 = vadd.f32 1.0, %v3085_v14 }
0x13ba   :  { %3086 = vrcp.f32 %v1161_v24 }
0x13c4   :  { %v3087_v25 = vpop.eup %3086 }
0x13c5   :  { %v1175_v32 = vsub.f32 1.0, %v3087_v25  ;;  %v1181_v34 = vmul.f32 %v3087_v25, %v1078_v15 }
0x141b   :  { %v1166_v26 = vpop.permute.xlu1 %1165 }
0x141c   :  { %v1168_v27 = vmul.f32 %v3087_v25, %v1166_v26 }
0x141e   :  { %1170 = vrot.lane.b32.xlu0 %v1168_v27, %s3177_s3  ;;  %v3503_v27 = vld [vmem:[%s3632_s7 + $0x1] ss:$0 sm:$0xff] }
0x1490   :  { %v1171_v19 = vpop.permute.xlu0 %1170 }
0x1491   :  { %v1173_v28 = vadd.f32 %v1171_v19, %v1084_v21  ;;  %v2461_v21 = vld [vmem:[%s3629_s4 + $0x38] sm:$0xff] }
0x1492   :  { %v2975_v22 = vpack.c.bf16 %v2461_v21, %v2460_v20 }
0x1493   :  { %3088 = vtanh.f32 %v1173_v28 }
0x149d   :  { %v3089_v30 = vpop.eup %3088 }
0x149e   :  { %1177 = vrot.lane.b32.xlu1 %v3089_v30, %s3176_s30 }
0x1510   :  { %v1178_v33 = vpop.permute.xlu1 %1177 }
0x1511   :  { %v1180_v35 = vmul.f32 %v1178_v33, %v1175_v32 }
0x1513   :  { %v1182_v36 = vadd.f32 %v1181_v34, %v1180_v35  ;;  %v2463_v34 = vld [vmem:[%s3631_s6 + $0x1] ss:$0 sm:$0xff] }
0x1515   :  { %1184 = vrot.lane.b32.xlu0 %v1182_v36, %s3176_s30 }
0x1587   :  { %v1185_v37 = vpop.permute.xlu0 %1184 }
0x1588   :  { %1187 = vst.msk [vmem:[#allocation3 + $0xa] sm:$0x3] %vm666_vm11, %v1185_v37  ;;  %2750 = vmatmul.mubr.msk.f32.vlgmr.msra.gmra.mrb[8].mxu0 %vm162_vm4, %v1185_v37 }
0x1589   :  { %2771 = vmatprep.mubr.msk.f32.mxu0 %vm162_vm4, %v1396_v38  ;;  %2974 = vmatpush3.bf16.msra.mxu0 %v2971_v18 }
0x158a   :  { %2976 = vmatprep.subr.bf16.mxu0 %v2975_v22 }
0x158d   :  { %2978 = vmatpush3.bf16.msra.mxu0 %v2975_v22 }
0x158e   :  { %2985 = vmatprep.subr.bf16.mxu0 %v3178_v13 }
0x165b   :  { %v1257_v39 = vpop.f32.mrb[8].mxu0 }
0x165c   :  { %v1258_v40 = vadd.f32 %v3359_v29, %v1257_v39  ;;  %v2751_v41 = vpop.f32.mrb[9].mxu0 }
0x165e   :  { %1269 = vrot.lane.b32.xlu1 %v1258_v40, %s3177_s3  ;;  %v1261_v43 = vadd.f32 %v1258_v40, %v1188_v42 }
0x1660   :  { %v2450_v44 = vmul.f32 -1.442695, %v1261_v43 }
0x1662   :  { %3090 = vpow2.f32 %v2450_v44 }
0x166c   :  { %v3091_v45 = vpop.eup %3090 }
0x166d   :  { %v1265_v46 = vadd.f32 1.0, %v3091_v45 }
0x166f   :  { %3092 = vrcp.f32 %v1265_v46 }
0x1679   :  { %v3093_v47 = vpop.eup %3092 }
0x167a   :  { %v1279_v53 = vsub.f32 1.0, %v3093_v47  ;;  %v1285_v55 = vmul.f32 %v3093_v47, %v1182_v36 }
0x16d0   :  { %v1270_v48 = vpop.permute.xlu1 %1269 }
0x16d1   :  { %v1272_v49 = vmul.f32 %v3093_v47, %v1270_v48 }
0x16d3   :  { %1274 = vrot.lane.b32.xlu0 %v1272_v49, %s3177_s3 }
0x1745   :  { %v1275_v50 = vpop.permute.xlu0 %1274 }
0x1746   :  { %v1277_v51 = vadd.f32 %v1275_v50, %v1188_v42 }
0x1748   :  { %3094 = vtanh.f32 %v1277_v51 }
0x1752   :  { %v3095_v52 = vpop.eup %3094 }
0x1753   :  { %1281 = vrot.lane.b32.xlu1 %v3095_v52, %s3176_s30 }
0x17c5   :  { %v1282_v54 = vpop.permute.xlu1 %1281 }
0x17c6   :  { %v1284_v56 = vmul.f32 %v1282_v54, %v1279_v53 }
0x17c8   :  { %v1286_v57 = vadd.f32 %v1285_v55, %v1284_v56 }
0x17ca   :  { %1288 = vrot.lane.b32.xlu0 %v1286_v57, %s3176_s30 }
0x183c   :  { %v1289_v58 = vpop.permute.xlu0 %1288 }
0x183d   :  { %1291 = vst.msk [vmem:[#allocation3 + $0xc] sm:$0x3] %vm666_vm11, %v1289_v58  ;;  %2761 = vmatmul.mubr.msk.f32.vlgmr.msra.gmra.mrb[14].mxu1 %vm162_vm4, %v1289_v58 }
0x183e   :  { %2782 = vmatprep.mubr.msk.f32.mxu1 %vm3179_vm9, %v3175_v31 }
0x1910   :  { %v1361_v59 = vpop.f32.mrb[14].mxu1 }
0x1911   :  { %v1362_v60 = vadd.f32 %v3359_v29, %v1361_v59  ;;  %v2762_v61 = vpop.f32.mrb[15].mxu1  ;;  %v2453_v29 = vld [vmem:[%s3630_s5 + $0x20] sm:$0xff] }
0x1912   :  { %v3467_v10 = vpack.c.bf16 %v2454_v8, %v2453_v29 }
0x1913   :  { %1373 = vrot.lane.b32.xlu1 %v1362_v60, %s3177_s3  ;;  %v1365_v63 = vadd.f32 %v1362_v60, %v1292_v62 }
0x1914   :  { %2981 = vmatpush3.bf16.msra.mxu1 %v3467_v10 }
0x1915   :  { %v2452_v0 = vmul.f32 -1.442695, %v1365_v63  ;;  %2982 = vmatprep.subr.bf16.mxu1 %v3178_v13 }
0x1917   :  { %3096 = vpow2.f32 %v2452_v0 }
0x1918   :  { %2984 = vmatpush3.bf16.msra.mxu1 %v3473_v12 }
0x1919   :  { %2991 = vmatprep.subr.bf16.mxu1 %v3178_v13 }
0x191b   :  { %2783 = vmatmul.mubr.f32.vlgmr.msra.gmra.mrb[16].mxu1 %v3175_v31 }
0x191c   :  { %2993 = vmatpush3.bf16.msra.mxu1 %v3467_v10  ;;  %2804 = vmatprep.mubr.msk.f32.mxu1 %vm3179_vm9, %v3175_v31 }
0x191d   :  { %2994 = vmatprep.subr.bf16.mxu1 %v3178_v13 }
0x1920   :  { %2996 = vmatpush3.bf16.msra.mxu1 %v3473_v12 }
0x1921   :  { %v3097_v1 = vpop.eup %3096  ;;  %3003 = vmatprep.subr.bf16.mxu1 %v3178_v13 }
0x1922   :  { %v1369_v2 = vadd.f32 1.0, %v3097_v1 }
0x1924   :  { %3098 = vrcp.f32 %v1369_v2 }
0x192e   :  { %v3099_v3 = vpop.eup %3098 }
0x192f   :  { %v1383_v23 = vsub.f32 1.0, %v3099_v3  ;;  %v1389_v24 = vmul.f32 %v3099_v3, %v1286_v57 }
0x1985   :  { %v1374_v4 = vpop.permute.xlu1 %1373 }
0x1986   :  { %v1376_v5 = vmul.f32 %v3099_v3, %v1374_v4 }
0x1988   :  { %1378 = vrot.lane.b32.xlu0 %v1376_v5, %s3177_s3 }
0x19ee   :  { %v1574_v19 = vpop.f32.mrb[16].mxu1 }
0x19ef   :  { %v1575_v28 = vadd.f32 %v3503_v27, %v1574_v19  ;;  %v2784_v30 = vpop.f32.mrb[17].mxu1 }
0x19fa   :  { %v1379_v6 = vpop.permute.xlu0 %1378 }
0x19fb   :  { %v1381_v7 = vadd.f32 %v1379_v6, %v1292_v62 }
0x19fd   :  { %3100 = vtanh.f32 %v1381_v7 }
0x1a07   :  { %v3101_v15 = vpop.eup %3100 }
0x1a08   :  { %1385 = vrot.lane.b32.xlu1 %v3101_v15, %s3176_s30 }
0x1a0c   :  { %1586 = vrot.lane.b32.xlu1 %v1575_v28, %s3177_s3 }
0x1a7a   :  { %v1386_v14 = vpop.permute.xlu1 %1385 }
0x1a7b   :  { %v1388_v25 = vmul.f32 %v1386_v14, %v1383_v23 }
0x1a7d   :  { %v1390_v26 = vadd.f32 %v1389_v24, %v1388_v25 }
0x1a7e   :  { %v1587_v44 = vpop.permute.xlu1 %1586 }
0x1a7f   :  { %1392 = vrot.lane.b32.xlu0 %v1390_v26, %s3176_s30 }
0x1af1   :  { %v1393_v32 = vpop.permute.xlu0 %1392 }
0x1af2   :  { %1395 = vst.msk [vmem:[#allocation3 + $0xe] sm:$0x3] %vm666_vm11, %v1393_v32 }
0x1af9   :  { %v1397_v33 = vld [vmem:[#allocation3 + $0x8] sm:$0xff] }
0x1afa   :  { %2772 = vmatmul.mubr.msk.f32.vlgmr.msra.gmra.mrb[10].mxu0 %vm162_vm4, %v1397_v33 }
0x1afb   :  { %2987 = vmatpush3.bf16.msra.mxu0 %v3467_v10  ;;  %2793 = vmatprep.mubr.msk.f32.mxu0 %vm3179_vm9, %v3175_v31 }
0x1afc   :  { %2988 = vmatprep.subr.bf16.mxu0 %v3178_v13 }
0x1aff   :  { %2990 = vmatpush3.bf16.msra.mxu0 %v3473_v12 }
0x1b00   :  { %2997 = vmatprep.subr.bf16.mxu0 %v3178_v13 }
0x1bcd   :  { %v2773_v35 = vpop.f32.mrb[10].mxu0 }
0x1bce   :  { %v1496_v36 = vadd.f32 %v2773_v35, %v2463_v34  ;;  %v1490_v37 = vpop.f32.mrb[11].mxu0 }
0x1bcf   :  { %v1491_v38 = vadd.f32 %v2463_v34, %v1490_v37 }
0x1bd0   :  { %1500 = vst.msk [vmem:[#allocation2 + $0x8] sm:$0xff] %vm553_vm10, %v1496_v36 }
0x1bd1   :  { %1499 = vst.msk [vmem:[#allocation2] sm:$0xff] %vm553_vm10, %v1491_v38 }
0x1bd8   :  { %v1501_v39 = vld [vmem:[#allocation2] sm:$0x3]  ;;  %v1604_v59 = vld [vmem:[#allocation2 + $0x2] sm:$0x3]  ;;  %v1706_v18 = vld [vmem:[#allocation2 + $0x4] sm:$0x3] }
0x1bd9   :  { %v1578_v40 = vadd.f32 %v1575_v28, %v1501_v39 }
0x1bdb   :  { %v2467_v41 = vmul.f32 -1.442695, %v1578_v40  ;;  %v1808_v40 = vld [vmem:[#allocation2 + $0x6] sm:$0x3] }
0x1bdd   :  { %3102 = vpow2.f32 %v2467_v41 }
0x1be7   :  { %v3103_v42 = vpop.eup %3102 }
0x1be8   :  { %v1582_v43 = vadd.f32 1.0, %v3103_v42 }
0x1bea   :  { %3104 = vrcp.f32 %v1582_v43 }
0x1bf4   :  { %v3105_v45 = vpop.eup %3104 }
0x1bf5   :  { %v1589_v46 = vmul.f32 %v3105_v45, %v1587_v44  ;;  %v1596_v50 = vsub.f32 1.0, %v3105_v45  ;;  %v1602_v52 = vmul.f32 0.0, %v3105_v45 }
0x1bf7   :  { %1591 = vrot.lane.b32.xlu0 %v1589_v46, %s3177_s3 }
0x1c69   :  { %v1592_v47 = vpop.permute.xlu0 %1591 }
0x1c6a   :  { %v1594_v48 = vadd.f32 %v1592_v47, %v1501_v39 }
0x1c6c   :  { %3106 = vtanh.f32 %v1594_v48 }
0x1c76   :  { %v3107_v49 = vpop.eup %3106 }
0x1c77   :  { %1598 = vrot.lane.b32.xlu1 %v3107_v49, %s3176_s30 }
0x1ce9   :  { %v1599_v51 = vpop.permute.xlu1 %1598 }
0x1cea   :  { %v1601_v53 = vmul.f32 %v1599_v51, %v1596_v50 }
0x1cec   :  { %v1603_v54 = vadd.f32 %v1602_v52, %v1601_v53 }
0x1cee   :  { %1606 = vrot.lane.b32.xlu0 %v1603_v54, %s3176_s30 }
0x1d60   :  { %v1607_v55 = vpop.permute.xlu0 %1606 }
0x1d61   :  { %2794 = vmatmul.mubr.msk.f32.vlgmr.msra.gmra.mrb[12].mxu0 %vm162_vm4, %v1607_v55 }
0x1d62   :  { %2999 = vmatpush3.bf16.msra.mxu0 %v3467_v10  ;;  %2815 = vmatprep.mubr.msk.f32.mxu0 %vm3179_vm9, %v3175_v31 }
0x1d63   :  { %3000 = vmatprep.subr.bf16.mxu0 %v3178_v13 }
0x1d66   :  { %3002 = vmatpush3.bf16.msra.mxu0 %v3473_v12 }
0x1d67   :  { %3009 = vmatprep.subr.bf16.mxu0 %v3178_v13 }
0x1e34   :  { %v1676_v56 = vpop.f32.mrb[12].mxu0 }
0x1e35   :  { %v1677_v57 = vadd.f32 %v3503_v27, %v1676_v56  ;;  %v2795_v58 = vpop.f32.mrb[13].mxu0 }
0x1e37   :  { %1688 = vrot.lane.b32.xlu1 %v1677_v57, %s3177_s3  ;;  %v1680_v60 = vadd.f32 %v1677_v57, %v1604_v59 }
0x1e39   :  { %v2469_v61 = vmul.f32 -1.442695, %v1680_v60  ;;  %v1910_v60 = vld [vmem:[#allocation2 + $0x8] sm:$0x3] }
0x1e3b   :  { %3108 = vpow2.f32 %v2469_v61 }
0x1e45   :  { %v3109_v62 = vpop.eup %3108 }
0x1e46   :  { %v1684_v63 = vadd.f32 1.0, %v3109_v62 }
0x1e48   :  { %3110 = vrcp.f32 %v1684_v63 }
0x1e52   :  { %v3111_v0 = vpop.eup %3110 }
0x1e53   :  { %v1698_v6 = vsub.f32 1.0, %v3111_v0  ;;  %v1704_v29 = vmul.f32 %v3111_v0, %v1603_v54 }
0x1ea9   :  { %v1689_v1 = vpop.permute.xlu1 %1688 }
0x1eaa   :  { %v1691_v2 = vmul.f32 %v3111_v0, %v1689_v1 }
0x1eac   :  { %1693 = vrot.lane.b32.xlu0 %v1691_v2, %s3177_s3 }
0x1f1e   :  { %v1694_v3 = vpop.permute.xlu0 %1693 }
0x1f1f   :  { %v1696_v4 = vadd.f32 %v1694_v3, %v1604_v59 }
0x1f21   :  { %3112 = vtanh.f32 %v1696_v4 }
0x1f2b   :  { %v3113_v5 = vpop.eup %3112 }
0x1f2c   :  { %1700 = vrot.lane.b32.xlu1 %v3113_v5, %s3176_s30 }
0x1f9e   :  { %v1701_v7 = vpop.permute.xlu1 %1700 }
0x1f9f   :  { %v1703_v8 = vmul.f32 %v1701_v7, %v1698_v6 }
0x1fa1   :  { %v1705_v9 = vadd.f32 %v1704_v29, %v1703_v8 }
0x1fa3   :  { %1708 = vrot.lane.b32.xlu0 %v1705_v9, %s3176_s30 }
0x2015   :  { %v1709_v11 = vpop.permute.xlu0 %1708 }
0x2016   :  { %2805 = vmatmul.mubr.msk.f32.vlgmr.msra.gmra.mrb[18].mxu1 %vm162_vm4, %v1709_v11 }
0x2017   :  { %3005 = vmatpush3.bf16.msra.mxu1 %v3467_v10  ;;  %2826 = vmatprep.mubr.msk.f32.mxu1 %vm3179_vm9, %v3175_v31 }
0x2018   :  { %3006 = vmatprep.subr.bf16.mxu1 %v3178_v13 }
0x201b   :  { %3008 = vmatpush3.bf16.msra.mxu1 %v3473_v12 }
0x201c   :  { %3015 = vmatprep.subr.bf16.mxu1 %v3178_v13 }
0x20e9   :  { %v1778_v15 = vpop.f32.mrb[18].mxu1 }
0x20ea   :  { %v1779_v16 = vadd.f32 %v3503_v27, %v1778_v15  ;;  %v2806_v17 = vpop.f32.mrb[19].mxu1 }
0x20ec   :  { %1790 = vrot.lane.b32.xlu1 %v1779_v16, %s3177_s3  ;;  %v1782_v20 = vadd.f32 %v1779_v16, %v1706_v18 }
0x20ee   :  { %v2471_v21 = vmul.f32 -1.442695, %v1782_v20  ;;  %v2012_v20 = vld [vmem:[#allocation2 + $0xa] sm:$0x3] }
0x20f0   :  { %3114 = vpow2.f32 %v2471_v21 }
0x20fa   :  { %v3115_v22 = vpop.eup %3114 }
0x20fb   :  { %v1786_v23 = vadd.f32 1.0, %v3115_v22 }
0x20fd   :  { %3116 = vrcp.f32 %v1786_v23 }
0x2107   :  { %v3117_v14 = vpop.eup %3116 }
0x2108   :  { %v1800_v30 = vsub.f32 1.0, %v3117_v14  ;;  %v1806_v33 = vmul.f32 %v3117_v14, %v1705_v9 }
0x215e   :  { %v1791_v24 = vpop.permute.xlu1 %1790 }
0x215f   :  { %v1793_v25 = vmul.f32 %v3117_v14, %v1791_v24 }
0x2161   :  { %1795 = vrot.lane.b32.xlu0 %v1793_v25, %s3177_s3 }
0x21d3   :  { %v1796_v26 = vpop.permute.xlu0 %1795 }
0x21d4   :  { %v1798_v19 = vadd.f32 %v1796_v26, %v1706_v18 }
0x21d6   :  { %3118 = vtanh.f32 %v1798_v19 }
0x21e0   :  { %v3119_v28 = vpop.eup %3118 }
0x21e1   :  { %1802 = vrot.lane.b32.xlu1 %v3119_v28, %s3176_s30 }
0x2253   :  { %v1803_v32 = vpop.permute.xlu1 %1802 }
0x2254   :  { %v1805_v34 = vmul.f32 %v1803_v32, %v1800_v30 }
0x2256   :  { %v1807_v35 = vadd.f32 %v1806_v33, %v1805_v34 }
0x2258   :  { %1810 = vrot.lane.b32.xlu0 %v1807_v35, %s3176_s30 }
0x22ca   :  { %v1811_v36 = vpop.permute.xlu0 %1810 }
0x22cb   :  { %2816 = vmatmul.mubr.msk.f32.vlgmr.msra.gmra.mrb[14].mxu0 %vm162_vm4, %v1811_v36 }
0x22cc   :  { %3011 = vmatpush3.bf16.msra.mxu0 %v3467_v10  ;;  %2837 = vmatprep.mubr.msk.f32.mxu0 %vm3179_vm9, %v3175_v31 }
0x22cd   :  { %3012 = vmatprep.subr.bf16.mxu0 %v3178_v13 }
0x22d0   :  { %3014 = vmatpush3.bf16.msra.mxu0 %v3473_v12 }
0x22d1   :  { %3021 = vmatprep.subr.bf16.mxu0 %v3178_v13 }
0x239e   :  { %v1880_v37 = vpop.f32.mrb[14].mxu0 }
0x239f   :  { %v1881_v38 = vadd.f32 %v3503_v27, %v1880_v37  ;;  %v2817_v39 = vpop.f32.mrb[15].mxu0 }
0x23a0   :  { %v2114_v39 = vld [vmem:[#allocation2 + $0xc] sm:$0x3] }
0x23a1   :  { %1892 = vrot.lane.b32.xlu1 %v1881_v38, %s3177_s3  ;;  %v1884_v41 = vadd.f32 %v1881_v38, %v1808_v40 }
0x23a3   :  { %v2473_v42 = vmul.f32 -1.442695, %v1884_v41 }
0x23a5   :  { %3120 = vpow2.f32 %v2473_v42 }
0x23af   :  { %v3121_v43 = vpop.eup %3120 }
0x23b0   :  { %v1888_v44 = vadd.f32 1.0, %v3121_v43 }
0x23b2   :  { %3122 = vrcp.f32 %v1888_v44 }
0x23bc   :  { %v3123_v45 = vpop.eup %3122 }
0x23bd   :  { %v1902_v51 = vsub.f32 1.0, %v3123_v45  ;;  %v1908_v53 = vmul.f32 %v3123_v45, %v1807_v35 }
0x2413   :  { %v1893_v46 = vpop.permute.xlu1 %1892 }
0x2414   :  { %v1895_v47 = vmul.f32 %v3123_v45, %v1893_v46 }
0x2416   :  { %1897 = vrot.lane.b32.xlu0 %v1895_v47, %s3177_s3 }
0x2488   :  { %v1898_v48 = vpop.permute.xlu0 %1897 }
0x2489   :  { %v1900_v49 = vadd.f32 %v1898_v48, %v1808_v40 }
0x248b   :  { %3124 = vtanh.f32 %v1900_v49 }
0x2495   :  { %v3125_v50 = vpop.eup %3124 }
0x2496   :  { %1904 = vrot.lane.b32.xlu1 %v3125_v50, %s3176_s30 }
0x2508   :  { %v1905_v52 = vpop.permute.xlu1 %1904 }
0x2509   :  { %v1907_v54 = vmul.f32 %v1905_v52, %v1902_v51 }
0x250b   :  { %v1909_v55 = vadd.f32 %v1908_v53, %v1907_v54 }
0x250d   :  { %1912 = vrot.lane.b32.xlu0 %v1909_v55, %s3176_s30 }
0x257f   :  { %v1913_v56 = vpop.permute.xlu0 %1912 }
0x2580   :  { %2827 = vmatmul.mubr.msk.f32.vlgmr.msra.gmra.mrb[20].mxu1 %vm162_vm4, %v1913_v56 }
0x2581   :  { %3017 = vmatpush3.bf16.msra.mxu1 %v3467_v10  ;;  %2848 = vmatprep.mubr.msk.f32.mxu1 %vm3179_vm9, %v3175_v31 }
0x2582   :  { %3018 = vmatprep.subr.bf16.mxu1 %v3178_v13 }
0x2585   :  { %3020 = vmatpush3.bf16.msra.mxu1 %v3473_v12 }
0x2586   :  { %3027 = vmatprep.subr.bf16.mxu1 %v3178_v13 }
0x2653   :  { %v1982_v57 = vpop.f32.mrb[20].mxu1 }
0x2654   :  { %v1983_v58 = vadd.f32 %v3503_v27, %v1982_v57  ;;  %v2828_v59 = vpop.f32.mrb[21].mxu1 }
0x2656   :  { %1994 = vrot.lane.b32.xlu1 %v1983_v58, %s3177_s3  ;;  %v1986_v61 = vadd.f32 %v1983_v58, %v1910_v60  ;;  %v2216_v58 = vld [vmem:[#allocation2 + $0xe] sm:$0x3] }
0x2658   :  { %v2475_v62 = vmul.f32 -1.442695, %v1986_v61 }
0x265a   :  { %3126 = vpow2.f32 %v2475_v62 }
0x2664   :  { %v3127_v63 = vpop.eup %3126 }
0x2665   :  { %v1990_v0 = vadd.f32 1.0, %v3127_v63 }
0x2667   :  { %3128 = vrcp.f32 %v1990_v0 }
0x2671   :  { %v3129_v1 = vpop.eup %3128 }
0x2672   :  { %v2004_v7 = vsub.f32 1.0, %v3129_v1  ;;  %v2010_v8 = vmul.f32 %v3129_v1, %v1909_v55 }
0x26c8   :  { %v1995_v2 = vpop.permute.xlu1 %1994 }
0x26c9   :  { %v1997_v3 = vmul.f32 %v3129_v1, %v1995_v2 }
0x26cb   :  { %1999 = vrot.lane.b32.xlu0 %v1997_v3, %s3177_s3 }
0x273d   :  { %v2000_v4 = vpop.permute.xlu0 %1999 }
0x273e   :  { %v2002_v5 = vadd.f32 %v2000_v4, %v1910_v60  ;;  %v2319_v4 = vld [vmem:[%s3633_s8 + $0x8] sm:$0xff] }
0x2740   :  { %3130 = vtanh.f32 %v2002_v5  ;;  %v2320_v5 = vld [vmem:[%s3633_s8 + $0x10] sm:$0xff] }
0x274a   :  { %v3131_v6 = vpop.eup %3130 }
0x274b   :  { %2006 = vrot.lane.b32.xlu1 %v3131_v6, %s3176_s30 }
0x27bd   :  { %v2007_v29 = vpop.permute.xlu1 %2006 }
0x27be   :  { %v2009_v9 = vmul.f32 %v2007_v29, %v2004_v7  ;;  %v2321_v7 = vld [vmem:[%s3633_s8 + $0x18] sm:$0xff] }
0x27bf   :  { %v3031_v29 = vpack.c.bf16 %v2321_v7, %v2320_v5 }
0x27c0   :  { %v2011_v11 = vadd.f32 %v2010_v8, %v2009_v9 }
0x27c2   :  { %2014 = vrot.lane.b32.xlu0 %v2011_v11, %s3176_s30 }
0x2834   :  { %v2015_v15 = vpop.permute.xlu0 %2014 }
0x2835   :  { %2838 = vmatmul.mubr.msk.f32.vlgmr.msra.gmra.mrb[16].mxu0 %vm162_vm4, %v2015_v15 }
0x2836   :  { %3023 = vmatpush3.bf16.msra.mxu0 %v3467_v10  ;;  %2859 = vmatprep.mubr.msk.f32.mxu0 %vm3179_vm9, %v3175_v31 }
0x2837   :  { %3024 = vmatprep.subr.bf16.mxu0 %v3178_v13 }
0x283a   :  { %3026 = vmatpush3.bf16.msra.mxu0 %v3473_v12 }
0x2908   :  { %v2084_v16 = vpop.f32.mrb[16].mxu0 }
0x2909   :  { %v2085_v17 = vadd.f32 %v3503_v27, %v2084_v16  ;;  %v2839_v18 = vpop.f32.mrb[17].mxu0 }
0x290b   :  { %2096 = vrot.lane.b32.xlu1 %v2085_v17, %s3177_s3  ;;  %v2088_v21 = vadd.f32 %v2085_v17, %v2012_v20 }
0x290d   :  { %v2477_v22 = vmul.f32 -1.442695, %v2088_v21 }
0x290f   :  { %3132 = vpow2.f32 %v2477_v22 }
0x2919   :  { %v3133_v23 = vpop.eup %3132 }
0x291a   :  { %v2092_v14 = vadd.f32 1.0, %v3133_v23 }
0x291c   :  { %3134 = vrcp.f32 %v2092_v14 }
0x2926   :  { %v3135_v10 = vpop.eup %3134 }
0x2927   :  { %v2106_v28 = vsub.f32 1.0, %v3135_v10  ;;  %v2112_v32 = vmul.f32 %v3135_v10, %v2011_v11 }
0x297d   :  { %v2097_v24 = vpop.permute.xlu1 %2096 }
0x297e   :  { %v2099_v25 = vmul.f32 %v3135_v10, %v2097_v24 }
0x2980   :  { %2101 = vrot.lane.b32.xlu0 %v2099_v25, %s3177_s3 }
0x29f2   :  { %v2102_v26 = vpop.permute.xlu0 %2101 }
0x29f3   :  { %v2104_v12 = vadd.f32 %v2102_v26, %v2012_v20  ;;  %v2482_v20 = vld [vmem:[%s3634_s9] ss:$0 sm:$0xff] }
0x29f5   :  { %3136 = vtanh.f32 %v2104_v12 }
0x29ff   :  { %v3137_v19 = vpop.eup %3136 }
0x2a00   :  { %2108 = vrot.lane.b32.xlu1 %v3137_v19, %s3176_s30 }
0x2a72   :  { %v2109_v30 = vpop.permute.xlu1 %2108 }
0x2a73   :  { %v2111_v33 = vmul.f32 %v2109_v30, %v2106_v28 }
0x2a75   :  { %v2113_v34 = vadd.f32 %v2112_v32, %v2111_v33 }
0x2a77   :  { %2116 = vrot.lane.b32.xlu0 %v2113_v34, %s3176_s30 }
0x2ae9   :  { %v2117_v35 = vpop.permute.xlu0 %2116 }
0x2aea   :  { %2849 = vmatmul.mubr.msk.f32.vlgmr.msra.gmra.mrb[22].mxu1 %vm162_vm4, %v2117_v35 }
0x2aeb   :  { %2870 = vmatprep.mubr.msk.f32.mxu1 %vm3179_vm9, %v3175_v31 }
0x2bbd   :  { %v2186_v36 = vpop.f32.mrb[22].mxu1 }
0x2bbe   :  { %v2187_v37 = vadd.f32 %v3503_v27, %v2186_v36  ;;  %v2850_v38 = vpop.f32.mrb[23].mxu1 }
0x2bc0   :  { %2198 = vrot.lane.b32.xlu1 %v2187_v37, %s3177_s3  ;;  %v2190_v40 = vadd.f32 %v2187_v37, %v2114_v39 }
0x2bc2   :  { %v2479_v41 = vmul.f32 -1.442695, %v2190_v40 }
0x2bc4   :  { %3138 = vpow2.f32 %v2479_v41 }
0x2bce   :  { %v3139_v42 = vpop.eup %3138 }
0x2bcf   :  { %v2194_v43 = vadd.f32 1.0, %v3139_v42 }
0x2bd1   :  { %3140 = vrcp.f32 %v2194_v43 }
0x2bdb   :  { %v3141_v44 = vpop.eup %3140 }
0x2bdc   :  { %v2208_v49 = vsub.f32 1.0, %v3141_v44  ;;  %v2214_v51 = vmul.f32 %v3141_v44, %v2113_v34 }
0x2c32   :  { %v2199_v45 = vpop.permute.xlu1 %2198 }
0x2c33   :  { %v2201_v46 = vmul.f32 %v3141_v44, %v2199_v45 }
0x2c35   :  { %2203 = vrot.lane.b32.xlu0 %v2201_v46, %s3177_s3 }
0x2ca7   :  { %v2204_v47 = vpop.permute.xlu0 %2203 }
0x2ca8   :  { %v2206_v31 = vadd.f32 %v2204_v47, %v2114_v39 }
0x2caa   :  { %3142 = vtanh.f32 %v2206_v31 }
0x2cb4   :  { %v3143_v48 = vpop.eup %3142 }
0x2cb5   :  { %2210 = vrot.lane.b32.xlu1 %v3143_v48, %s3176_s30 }
0x2d27   :  { %v2211_v50 = vpop.permute.xlu1 %2210 }
0x2d28   :  { %v2213_v52 = vmul.f32 %v2211_v50, %v2208_v49 }
0x2d2a   :  { %v2215_v53 = vadd.f32 %v2214_v51, %v2213_v52 }
0x2d2c   :  { %2218 = vrot.lane.b32.xlu0 %v2215_v53, %s3176_s30 }
0x2d9e   :  { %v2219_v54 = vpop.permute.xlu0 %2218 }
0x2d9f   :  { %2860 = vmatmul.mubr.msk.f32.vlgmr.msra.gmra.mrb[18].mxu0 %vm162_vm4, %v2219_v54 }
0x2e72   :  { %v2288_v55 = vpop.f32.mrb[18].mxu0 }
0x2e73   :  { %v2289_v56 = vadd.f32 %v3503_v27, %v2288_v55  ;;  %v2861_v57 = vpop.f32.mrb[19].mxu0  ;;  %v2318_v27 = vld [vmem:[%s3633_s8] sm:$0xff] }
0x2e74   :  { %v3028_v6 = vpack.c.bf16 %v2319_v4, %v2318_v27 }
0x2e75   :  { %2300 = vrot.lane.b32.xlu1 %v2289_v56, %s3177_s3  ;;  %v2292_v59 = vadd.f32 %v2289_v56, %v2216_v58 }
0x2e76   :  { %3029 = vmatpush3.bf16.msra.mxu1 %v3028_v6 }
0x2e77   :  { %v2481_v60 = vmul.f32 -1.442695, %v2292_v59  ;;  %3030 = vmatprep.subr.bf16.mxu1 %v3178_v13 }
0x2e79   :  { %3144 = vpow2.f32 %v2481_v60 }
0x2e7a   :  { %3032 = vmatpush3.bf16.msra.mxu1 %v3031_v29 }
0x2e83   :  { %v3145_v61 = vpop.eup %3144 }
0x2e84   :  { %v2296_v62 = vadd.f32 1.0, %v3145_v61 }
0x2e86   :  { %3146 = vrcp.f32 %v2296_v62 }
0x2e90   :  { %v3147_v63 = vpop.eup %3146 }
0x2e91   :  { %v2310_v9 = vsub.f32 1.0, %v3147_v63  ;;  %v2316_v15 = vmul.f32 %v3147_v63, %v2215_v53 }
0x2ee7   :  { %v2301_v0 = vpop.permute.xlu1 %2300 }
0x2ee8   :  { %v2303_v1 = vmul.f32 %v3147_v63, %v2301_v0 }
0x2eea   :  { %2305 = vrot.lane.b32.xlu0 %v2303_v1, %s3177_s3 }
0x2f5c   :  { %v2306_v2 = vpop.permute.xlu0 %2305 }
0x2f5d   :  { %v2308_v3 = vadd.f32 %v2306_v2, %v2216_v58 }
0x2f5f   :  { %3148 = vtanh.f32 %v2308_v3 }
0x2f69   :  { %v3149_v8 = vpop.eup %3148 }
0x2f6a   :  { %2312 = vrot.lane.b32.xlu1 %v3149_v8, %s3176_s30 }
0x2fdc   :  { %v2313_v11 = vpop.permute.xlu1 %2312 }
0x2fdd   :  { %v2315_v16 = vmul.f32 %v2313_v11, %v2310_v9 }
0x2fdf   :  { %v2317_v17 = vadd.f32 %v2316_v15, %v2315_v16 }
0x2fe1   :  { %2330 = vrot.lane.b32.xlu0 %v2317_v17, %s3176_s30 }
0x3053   :  { %v2331_v18 = vpop.permute.xlu0 %2330 }
0x3054   :  { %2871 = vmatmul.mubr.msk.f32.vlgmr.msra.gmra.mrb[24].mxu1 %vm162_vm4, %v2331_v18 }
0x3127   :  { %v2400_v13 = vpop.f32.mrb[24].mxu1 }
0x3128   :  { %v2401_v21 = vadd.f32 %v2482_v20, %v2400_v13  ;;  %v2872_v22 = vpop.f32.mrb[25].mxu1 }
0x312a   :  { %2405 = vst.msk [vmem:[#allocation4] sm:$0x3] %vm2404_vm12, %v2401_v21 }
0x312b   :  { %3161 = shalt.err (!%p3158_p4)
}
0x312c   :  { %s3162_s14 = scalar_lea.hbm %s3635_s10, 32 }
0x312d   :  { %p3163_p5 = scmp.ne.s32.totalorder %s3635_s10, %s3162_s14  ;;  %p3166_p6 = scmp.lt.u32.totalorder %s3162_s14, %s3635_s10 }
0x312f   :  { %p3168_p7 = pnand %p3166_p6, %p3163_p5 }
0x3131   :  { %3171 = shalt.err (!%p3168_p7)
}
0x3132   :  { %2415 = dma.vmem_to_hbm [thread:$0]  %s2413_s0, 32, %s3635_s10, [#allocation5]  }
0x3133   :  { %3172 = dma.done.wait [#allocation5], 32  }
0x3134   :  { %3173 = vsyncadd [#allocation5], 4294967264 }
0x3135   :  { %2419 = vsyncpa [#allocation5], 1 }

</bundles_post_ra>
